<compile_context>
chip_gen: v5e
topology: v5e:2x2
jax: 0.10.0
libtpu: 0.0.40
codegen_flags: <defaults>
</compile_context>

<pallas_src>
import math
from functools import partial

import jax
import jax.numpy as jnp
from jax.experimental import pallas as pl
from jax.experimental.pallas import tpu as pltpu

# MXU input dtype (f32 accumulate everywhere).
_COMPUTE_DTYPE = jnp.bfloat16

# Conservative per-call VMEM budget for the fully fused sub-block kernels.
_VMEM_FUSED_LIMIT = 24 * 1024 * 1024  # bytes


def _pick_tile(dim, candidates):
    """Largest candidate tile that evenly divides `dim`, else the full dim."""
    for c in candidates:
        if dim >= c and dim % c == 0:
            return c
    return dim


def _layernorm_f32(x, g, b, eps):
    # x: (rows, E) f32; g/b: (1, E) f32.  Biased variance (PyTorch LayerNorm).
    mean = jnp.mean(x, axis=-1, keepdims=True)
    xc = x - mean
    var = jnp.mean(xc * xc, axis=-1, keepdims=True)
    inv = jax.lax.rsqrt(var + eps)
    return xc * inv * g + b


# ---------------- Fused sub-block kernels ----------------

def _attn_block_kernel(x_ref, g1_ref, b1_ref, wqkv_ref, bqkv_ref,
                       wo_ref, bo_ref, o_ref, *, nhead, scale, eps):
    # One batch per grid step:
    #   h = LN1(x); qkv = h@Wqkv+b; attn = MHA(qkv); out = x + attn@Wo + bo
    x = x_ref[...].astype(jnp.float32)                       # (S, E)
    S, E = x.shape
    Dh = E // nhead

    xn = _layernorm_f32(x, g1_ref[...], b1_ref[...], eps)
    qkv = jnp.dot(xn.astype(_COMPUTE_DTYPE),
                  wqkv_ref[...].astype(_COMPUTE_DTYPE),
                  preferred_element_type=jnp.float32) + bqkv_ref[...]   # (S, 3E)

    outs = []
    for h in range(nhead):
        q = qkv[:, h * Dh:(h + 1) * Dh].astype(_COMPUTE_DTYPE)
        k = qkv[:, E + h * Dh:E + (h + 1) * Dh].astype(_COMPUTE_DTYPE)
        v = qkv[:, 2 * E + h * Dh:2 * E + (h + 1) * Dh].astype(_COMPUTE_DTYPE)
        s = jax.lax.dot_general(q, k, (((1,), (1,)), ((), ())),
                                preferred_element_type=jnp.float32) * scale
        m = jnp.max(s, axis=-1, keepdims=True)
        p = jnp.exp(s - m)
        l = jnp.sum(p, axis=-1, keepdims=True)
        p = p * pl.reciprocal(l, approx=True)                # divide -> EUP slot
        outs.append(jnp.dot(p.astype(_COMPUTE_DTYPE), v,
                            preferred_element_type=jnp.float32))
    attn = jnp.concatenate(outs, axis=-1)                    # (S, E) f32

    y = jnp.dot(attn.astype(_COMPUTE_DTYPE),
                wo_ref[...].astype(_COMPUTE_DTYPE),
                preferred_element_type=jnp.float32) + bo_ref[...]
    o_ref[...] = (x + y).astype(o_ref.dtype)


def _ffn_block_kernel(x_ref, g2_ref, b2ln_ref, w1_ref, b1_ref,
                      w2_ref, b2_ref, o_ref, *, eps):
    # out = x + Linear2(ReLU(Linear1(LN2(x))))
    x = x_ref[...].astype(jnp.float32)
    xn = _layernorm_f32(x, g2_ref[...], b2ln_ref[...], eps)
    h = jnp.dot(xn.astype(_COMPUTE_DTYPE), w1_ref[...].astype(_COMPUTE_DTYPE),
                preferred_element_type=jnp.float32) + b1_ref[...]
    h = jnp.maximum(h, 0.0)
    y = jnp.dot(h.astype(_COMPUTE_DTYPE), w2_ref[...].astype(_COMPUTE_DTYPE),
                preferred_element_type=jnp.float32) + b2_ref[...]
    o_ref[...] = (x + y).astype(o_ref.dtype)


# ---------------- General (fallback / final-projection) kernels ----------------

def _ln_linear_kernel(x_ref, g_ref, bln_ref, w_ref, b_ref, o_ref, *, eps, relu):
    # Fused LayerNorm (full row, f32 stats) -> matmul (bf16 MXU, f32 acc)
    # -> bias (+ optional ReLU).
    x = x_ref[...].astype(jnp.float32)
    xn = _layernorm_f32(x, g_ref[...], bln_ref[...], eps)
    y = jnp.dot(xn.astype(_COMPUTE_DTYPE), w_ref[...].astype(_COMPUTE_DTYPE),
                preferred_element_type=jnp.float32)
    y = y + b_ref[...]
    if relu:
        y = jnp.maximum(y, 0.0)
    o_ref[...] = y.astype(o_ref.dtype)


def _linear_residual_kernel(x_ref, w_ref, b_ref, res_ref, o_ref, acc_ref):
    # Tiled matmul with K-reduction accumulator; bias + residual fused into the
    # final-k epilogue.
    k = pl.program_id(2)

    @pl.when(k == 0)
    def _():
        acc_ref[...] = jnp.zeros_like(acc_ref)

    acc_ref[...] += jnp.dot(x_ref[...].astype(_COMPUTE_DTYPE),
                            w_ref[...].astype(_COMPUTE_DTYPE),
                            preferred_element_type=jnp.float32)

    @pl.when(k == pl.num_programs(2) - 1)
    def _():
        y = acc_ref[...] + b_ref[...] + res_ref[...].astype(jnp.float32)
        o_ref[...] = y.astype(o_ref.dtype)


def _attn_kernel(qkv_ref, o_ref, *, nhead, scale):
    # Standalone attention fallback: one batch per grid step from a packed
    # (S, 3E) QKV block.
    S, threeE = qkv_ref.shape
    E = threeE // 3
    Dh = E // nhead
    qkv = qkv_ref[...]
    outs = []
    for h in range(nhead):
        q = qkv[:, h * Dh:(h + 1) * Dh].astype(_COMPUTE_DTYPE)
        k = qkv[:, E + h * Dh:E + (h + 1) * Dh].astype(_COMPUTE_DTYPE)
        v = qkv[:, 2 * E + h * Dh:2 * E + (h + 1) * Dh].astype(_COMPUTE_DTYPE)
        s = jax.lax.dot_general(q, k, (((1,), (1,)), ((), ())),
                                preferred_element_type=jnp.float32) * scale
        m = jnp.max(s, axis=-1, keepdims=True)
        p = jnp.exp(s - m)
        l = jnp.sum(p, axis=-1, keepdims=True)
        p = p * pl.reciprocal(l, approx=True)
        outs.append(jnp.dot(p.astype(_COMPUTE_DTYPE), v,
                            preferred_element_type=jnp.float32))
    o_ref[...] = jnp.concatenate(outs, axis=-1).astype(o_ref.dtype)


# ---------------- Pallas wrappers ----------------

def attn_block(x, p, nhead, seq_len, eps=1e-5):
    # x: (B*S, E) batch-major.  One pallas_call for the whole attention
    # sub-block (LN1 + QKV + MHA + out_proj + residual), grid over batches.
    M, E = x.shape
    B = M // seq_len
    Dh = E // nhead
    scale = 1.0 / math.sqrt(Dh)
    cost = pl.CostEstimate(
        flops=2 * M * E * (3 * E) + 4 * B * nhead * seq_len * seq_len * Dh
              + 2 * M * E * E,
        transcendentals=B * nhead * seq_len * seq_len + M,
        bytes_accessed=4 * (2 * M * E + E * 3 * E + E * E))
    return pl.pallas_call(
        partial(_attn_block_kernel, nhead=nhead, scale=scale, eps=eps),
        out_shape=jax.ShapeDtypeStruct((M, E), x.dtype),
        grid=(B,),
        in_specs=[
            pl.BlockSpec((seq_len, E), lambda b: (b, 0)),      # x (per batch)
            pl.BlockSpec((1, E), lambda b: (0, 0)),            # ln1 gamma
            pl.BlockSpec((1, E), lambda b: (0, 0)),            # ln1 beta
            pl.BlockSpec((E, 3 * E), lambda b: (0, 0)),        # Wqkv
            pl.BlockSpec((1, 3 * E), lambda b: (0, 0)),        # bqkv
            pl.BlockSpec((E, E), lambda b: (0, 0)),            # Wo
            pl.BlockSpec((1, E), lambda b: (0, 0)),            # bo
        ],
        out_specs=pl.BlockSpec((seq_len, E), lambda b: (b, 0)),
        compiler_params=pltpu.CompilerParams(dimension_semantics=("parallel",)),
        cost_estimate=cost,
    )(x, p["ln1_g"].reshape(1, E), p["ln1_b"].reshape(1, E),
      p["in_proj_w"], p["in_proj_b"].reshape(1, 3 * E),
      p["out_proj_w"], p["out_proj_b"].reshape(1, E))


def ffn_block(x, p, eps=1e-5):
    # x: (M, E).  One pallas_call for LN2 + Linear1 + ReLU + Linear2 + residual.
    M, E = x.shape
    H = p["w1"].shape[1]
    tm = _pick_tile(M, (512, 256, 128))
    cost = pl.CostEstimate(flops=4 * M * E * H + 8 * M * E,
                           transcendentals=M,
                           bytes_accessed=4 * (2 * M * E + 2 * E * H))
    return pl.pallas_call(
        partial(_ffn_block_kernel, eps=eps),
        out_shape=jax.ShapeDtypeStruct((M, E), x.dtype),
        grid=(M // tm,),
        in_specs=[
            pl.BlockSpec((tm, E), lambda i: (i, 0)),           # x tile
            pl.BlockSpec((1, E), lambda i: (0, 0)),            # ln2 gamma
            pl.BlockSpec((1, E), lambda i: (0, 0)),            # ln2 beta
            pl.BlockSpec((E, H), lambda i: (0, 0)),            # W1
            pl.BlockSpec((1, H), lambda i: (0, 0)),            # b1
            pl.BlockSpec((H, E), lambda i: (0, 0)),            # W2
            pl.BlockSpec((1, E), lambda i: (0, 0)),            # b2
        ],
        out_specs=pl.BlockSpec((tm, E), lambda i: (i, 0)),
        compiler_params=pltpu.CompilerParams(dimension_semantics=("parallel",)),
        cost_estimate=cost,
    )(x, p["ln2_g"].reshape(1, E), p["ln2_b"].reshape(1, E),
      p["w1"], p["b1"].reshape(1, H), p["w2"], p["b2"].reshape(1, E))


def ln_linear(x, g, bln, w, b, relu=False, eps=1e-5):
    # y = (LayerNorm(x) @ w) + b, optional ReLU.  x: (M, K), w: (K, N).
    # K is kept whole per block (LN needs the full row); M/N are tiled.
    M, K = x.shape
    N = w.shape[1]
    tm = _pick_tile(M, (256, 128))
    tn = _pick_tile(N, (512, 256, 128))
    cost = pl.CostEstimate(flops=2 * M * N * K + 8 * M * K,
                           transcendentals=M,
                           bytes_accessed=4 * (M * K + K * N + M * N))
    return pl.pallas_call(
        partial(_ln_linear_kernel, eps=eps, relu=relu),
        out_shape=jax.ShapeDtypeStruct((M, N), x.dtype),
        grid=(M // tm, N // tn),
        in_specs=[
            pl.BlockSpec((tm, K), lambda i, j: (i, 0)),
            pl.BlockSpec((1, K), lambda i, j: (0, 0)),
            pl.BlockSpec((1, K), lambda i, j: (0, 0)),
            pl.BlockSpec((K, tn), lambda i, j: (0, j)),
            pl.BlockSpec((1, tn), lambda i, j: (0, j)),
        ],
        out_specs=pl.BlockSpec((tm, tn), lambda i, j: (i, j)),
        compiler_params=pltpu.CompilerParams(
            dimension_semantics=("parallel", "parallel")),
        cost_estimate=cost,
    )(x, g.reshape(1, K), bln.reshape(1, K), w, b.reshape(1, N))


def linear_residual(x, w, b, res):
    # y = res + (x @ w) + b.  Fully tiled (M, N, K) with f32 accumulator.
    M, K = x.shape
    N = w.shape[1]
    tm = _pick_tile(M, (256, 128))
    tn = _pick_tile(N, (512, 256, 128))
    tk = _pick_tile(K, (512, 256, 128))
    cost = pl.CostEstimate(flops=2 * M * N * K, transcendentals=0,
                           bytes_accessed=4 * (M * K + K * N + 2 * M * N))
    return pl.pallas_call(
        _linear_residual_kernel,
        out_shape=jax.ShapeDtypeStruct((M, N), x.dtype),
        grid=(M // tm, N // tn, K // tk),
        in_specs=[
            pl.BlockSpec((tm, tk), lambda i, j, k: (i, k)),
            pl.BlockSpec((tk, tn), lambda i, j, k: (k, j)),
            pl.BlockSpec((1, tn), lambda i, j, k: (0, j)),
            pl.BlockSpec((tm, tn), lambda i, j, k: (i, j)),
        ],
        out_specs=pl.BlockSpec((tm, tn), lambda i, j, k: (i, j)),
        scratch_shapes=[pltpu.VMEM((tm, tn), jnp.float32)],
        compiler_params=pltpu.CompilerParams(
            dimension_semantics=("parallel", "parallel", "arbitrary")),
        cost_estimate=cost,
    )(x, w, b.reshape(1, N), res)


def attention(qkv, nhead, seq_len):
    # qkv: (B*S, 3E) packed [q | k | v], batch-major rows -> (B*S, E).
    M, threeE = qkv.shape
    E = threeE // 3
    B = M // seq_len
    Dh = E // nhead
    scale = 1.0 / math.sqrt(Dh)
    return pl.pallas_call(
        partial(_attn_kernel, nhead=nhead, scale=scale),
        out_shape=jax.ShapeDtypeStruct((M, E), qkv.dtype),
        grid=(B,),
        in_specs=[pl.BlockSpec((seq_len, threeE), lambda b: (b, 0))],
        out_specs=pl.BlockSpec((seq_len, E), lambda b: (b, 0)),
        compiler_params=pltpu.CompilerParams(dimension_semantics=("parallel",)),
    )(qkv)


# ---------------- VMEM-fit heuristics for fused paths ----------------

def _attn_block_bytes(seq_len, E):
    act = 4 * (2 * 2 * seq_len * E + 2 * seq_len * 3 * E)      # x/out (dbl-buf) + qkv
    weights = 4 * (E * 3 * E + 3 * E + E * E + E + 2 * E)
    return act + weights


def _ffn_block_bytes(tm, E, H):
    act = 4 * (2 * 2 * tm * E + 2 * tm * H)                    # x/out (dbl-buf) + hidden
    weights = 4 * (E * H + H + H * E + E + 2 * E)
    return act + weights


# ---------------- Model (JAX glue between fused kernels) ----------------

def decoder_layer(x, p, nhead, seq_len):
    # x: (B*S, E), batch-major rows.
    M, E = x.shape
    H = p["w1"].shape[1]

    # h = norm1(x); h = self_attn(h,h,h); x = x + h
    if _attn_block_bytes(seq_len, E) <= _VMEM_FUSED_LIMIT:
        x = attn_block(x, p, nhead, seq_len)
    else:
        qkv = ln_linear(x, p["ln1_g"], p["ln1_b"], p["in_proj_w"], p["in_proj_b"])
        attn_o = attention(qkv, nhead, seq_len)
        x = linear_residual(attn_o, p["out_proj_w"], p["out_proj_b"], x)

    # h = norm2(x); h = linear2(relu(linear1(h))); x = x + h
    tm = _pick_tile(M, (512, 256, 128))
    if _ffn_block_bytes(tm, E, H) <= _VMEM_FUSED_LIMIT:
        x = ffn_block(x, p)
    else:
        h = ln_linear(x, p["ln2_g"], p["ln2_b"], p["w1"], p["b1"], relu=True)
        x = linear_residual(h, p["w2"], p["b2"], x)
    return x


def transformer_forward(tokens, params, nhead):
    # tokens: (B, S) int32
    B, S = tokens.shape
    # Embedding gather kept as XLA glue (no Pallas win at this scale).
    h = jnp.take(params["embed"], tokens, axis=0)        # (B, S, E)
    E = h.shape[-1]
    x = h.reshape(B * S, E)                              # lane-dense activation slab
    for p in params["layers"]:
        # PyTorch loop body runs the block TWICE per iteration:
        #   x = checkpoint_wrapper(block)(x); x = block(x)
        # checkpoint_wrapper only changes backward-pass memory, not forward math.
        x = decoder_layer(x, p, nhead, S)
        x = decoder_layer(x, p, nhead, S)
    # Final LN fused into fc_out; kernel output stays lane-dense (B*S, 1024).
    logits = ln_linear(x, params["ln_g"], params["ln_b"],
                       params["fc_w"], params["fc_b"])   # (B*S, vocab)
    V = logits.shape[-1]
    # Single permute at the very end (wrapper-side), matching x.permute(1, 2, 0).
    return logits.reshape(B, S, V).transpose(0, 2, 1)    # (B, vocab, S)


# ---------------- Deterministic parameter init ----------------

def init_params(key, d_model, nhead, num_layers, vocab=1024):
    E = d_model

    def nrm(k, shape, scale=0.02):
        return scale * jax.random.normal(k, shape, dtype=jnp.float32)

    keys = jax.random.split(key, 3 + num_layers)
    params = {
        "embed": nrm(keys[0], (vocab, E)),
        "ln_g": jnp.ones((E,), jnp.float32),
        "ln_b": jnp.zeros((E,), jnp.float32),
        "fc_w": nrm(keys[1], (E, vocab)),      # stored (in, out)
        "fc_b": jnp.zeros((vocab,), jnp.float32),
        "layers": [],
    }
    for l in range(num_layers):
        lk = jax.random.split(keys[3 + l], 4)
        params["layers"].append({
            "in_proj_w": nrm(lk[0], (E, 3 * E)),
            "in_proj_b": jnp.zeros((3 * E,), jnp.float32),
            "out_proj_w": nrm(lk[1], (E, E)),
            "out_proj_b": jnp.zeros((E,), jnp.float32),
            "w1": nrm(lk[2], (E, 4 * E)),
            "b1": jnp.zeros((4 * E,), jnp.float32),
            "w2": nrm(lk[3], (4 * E, E)),
            "b2": jnp.zeros((E,), jnp.float32),
            "ln1_g": jnp.ones((E,), jnp.float32),
            "ln1_b": jnp.zeros((E,), jnp.float32),
            "ln2_g": jnp.ones((E,), jnp.float32),
            "ln2_b": jnp.zeros((E,), jnp.float32),
        })
    return params


if __name__ == "__main__":
    B, S = 2, 8
    d_model, nhead, num_layers = 32, 4, 2
    vocab = 1024

    key = jax.random.PRNGKey(0)
    pkey, tkey = jax.random.split(key)
    params = init_params(pkey, d_model, nhead, num_layers, vocab)
    tokens = jax.random.randint(tkey, (B, S), 0, vocab, dtype=jnp.int32)

    fwd = jax.jit(partial(transformer_forward, nhead=nhead))
    out = fwd(tokens, params)
    out = jax.block_until_ready(out)

    assert out.shape == (B, vocab, S), out.shape
    assert out.dtype == jnp.float32
    assert bool(jnp.all(jnp.isfinite(out)))
    print("KERNEL_OK")
</pallas_src>

<mosaic_0001>
module attributes {stable_mosaic.version = 11 : i64} {
  func.func @_ln_linear_kernel(%arg0: i32, %arg1: i32, %arg2: memref<16x32xf32, #tpu.memory_space<vmem>>, %arg3: memref<1x32xf32, #tpu.memory_space<vmem>>, %arg4: memref<1x32xf32, #tpu.memory_space<vmem>>, %arg5: memref<32x512xf32, #tpu.memory_space<vmem>>, %arg6: memref<1x512xf32, #tpu.memory_space<vmem>>, %arg7: memref<16x512xf32, #tpu.memory_space<vmem>>) attributes {dimension_semantics = [#tpu.dimension_semantics<parallel>, #tpu.dimension_semantics<parallel>], iteration_bounds = array<i64: 1, 2>, scalar_prefetch = 0 : i64, scratch_operands = 0 : i64, tpu.core_type = #tpu.core_type<tc>, window_params = [{transform_indices = @transform_0, window_bounds = array<i64: 16, 32>}, {pipeline_mode = #tpu.pipeline_mode<synchronous>, transform_indices = @transform_1, window_bounds = array<i64: 1, 32>}, {pipeline_mode = #tpu.pipeline_mode<synchronous>, transform_indices = @transform_2, window_bounds = array<i64: 1, 32>}, {transform_indices = @transform_3, window_bounds = array<i64: 32, 512>}, {transform_indices = @transform_4, window_bounds = array<i64: 1, 512>}, {transform_indices = @transform_5, window_bounds = array<i64: 16, 512>}]} {
    %c0 = arith.constant 0 : index
    %c0_0 = arith.constant 0 : index
    %0 = vector.load %arg2[%c0, %c0_0] : memref<16x32xf32, #tpu.memory_space<vmem>>, vector<16x32xf32>
    %c0_1 = arith.constant 0 : index
    %c0_2 = arith.constant 0 : index
    %1 = vector.load %arg3[%c0_1, %c0_2] : memref<1x32xf32, #tpu.memory_space<vmem>>, vector<1x32xf32>
    %c0_3 = arith.constant 0 : index
    %c0_4 = arith.constant 0 : index
    %2 = vector.load %arg4[%c0_3, %c0_4] : memref<1x32xf32, #tpu.memory_space<vmem>>, vector<1x32xf32>
    %cst = arith.constant dense<0.000000e+00> : vector<16xf32>
    %3 = vector.multi_reduction <add>, %0, %cst [1] : vector<16x32xf32> to vector<16xf32>
    %4 = vector.shape_cast %3 : vector<16xf32> to vector<16x1xf32>
    %cst_5 = arith.constant 3.200000e+01 : f32
    %5 = vector.broadcast %cst_5 : f32 to vector<16x1xf32>
    %6 = arith.divf %4, %5 : vector<16x1xf32>
    %7 = vector.broadcast %6 : vector<16x1xf32> to vector<16x32xf32>
    %8 = arith.subf %0, %7 : vector<16x32xf32>
    %9 = arith.mulf %8, %8 : vector<16x32xf32>
    %cst_6 = arith.constant dense<0.000000e+00> : vector<16xf32>
    %10 = vector.multi_reduction <add>, %9, %cst_6 [1] : vector<16x32xf32> to vector<16xf32>
    %11 = vector.shape_cast %10 : vector<16xf32> to vector<16x1xf32>
    %cst_7 = arith.constant 3.200000e+01 : f32
    %12 = vector.broadcast %cst_7 : f32 to vector<16x1xf32>
    %13 = arith.divf %11, %12 : vector<16x1xf32>
    %cst_8 = arith.constant 9.99999974E-6 : f32
    %14 = vector.broadcast %cst_8 : f32 to vector<16x1xf32>
    %15 = arith.addf %13, %14 : vector<16x1xf32>
    %16 = math.rsqrt %15 : vector<16x1xf32>
    %17 = vector.broadcast %16 : vector<16x1xf32> to vector<16x32xf32>
    %18 = arith.mulf %8, %17 : vector<16x32xf32>
    %19 = vector.broadcast %1 : vector<1x32xf32> to vector<16x32xf32>
    %20 = arith.mulf %18, %19 : vector<16x32xf32>
    %21 = vector.broadcast %2 : vector<1x32xf32> to vector<16x32xf32>
    %22 = arith.addf %20, %21 : vector<16x32xf32>
    %23 = arith.truncf %22 : vector<16x32xf32> to vector<16x32xbf16>
    %c0_9 = arith.constant 0 : index
    %c0_10 = arith.constant 0 : index
    %24 = vector.load %arg5[%c0_9, %c0_10] : memref<32x512xf32, #tpu.memory_space<vmem>>, vector<32x512xf32>
    %25 = arith.truncf %24 : vector<32x512xf32> to vector<32x512xbf16>
    %cst_11 = arith.constant dense<0.000000e+00> : vector<16x512xf32>
    %26 = tpu.matmul %23, %25, %cst_11 {dimension_numbers = #tpu.dot_dimension_numbers<[1], [0], [0], [1], [0, 0, 1, 1], [], []>} : vector<16x32xbf16>, vector<32x512xbf16>, vector<16x512xf32> -> vector<16x512xf32>
    %c0_12 = arith.constant 0 : index
    %c0_13 = arith.constant 0 : index
    %27 = vector.load %arg6[%c0_12, %c0_13] : memref<1x512xf32, #tpu.memory_space<vmem>>, vector<1x512xf32>
    %28 = vector.broadcast %27 : vector<1x512xf32> to vector<16x512xf32>
    %29 = arith.addf %26, %28 : vector<16x512xf32>
    %c0_14 = arith.constant 0 : index
    %c0_15 = arith.constant 0 : index
    %30 = vector.load %arg7[%c0_14, %c0_15] : memref<16x512xf32, #tpu.memory_space<vmem>>, vector<16x512xf32>
    tpu.vector_store %arg7[%c0_14, %c0_15], %29 {strides = array<i32>} : memref<16x512xf32, #tpu.memory_space<vmem>>, vector<16x512xf32>,
    return
  }
  func.func @transform_0(%arg0: i32, %arg1: i32) -> (i32, i32) {
    %c0_i32 = arith.constant 0 : i32
    %c0_i32_0 = arith.constant 0 : i32
    return %arg0, %c0_i32 : i32, i32
  }
  func.func @transform_1(%arg0: i32, %arg1: i32) -> (i32, i32) {
    %c0_i32 = arith.constant 0 : i32
    %c0_i32_0 = arith.constant 0 : i32
    %c0_i32_1 = arith.constant 0 : i32
    return %c0_i32, %c0_i32_0 : i32, i32
  }
  func.func @transform_2(%arg0: i32, %arg1: i32) -> (i32, i32) {
    %c0_i32 = arith.constant 0 : i32
    %c0_i32_0 = arith.constant 0 : i32
    %c0_i32_1 = arith.constant 0 : i32
    return %c0_i32, %c0_i32_0 : i32, i32
  }
  func.func @transform_3(%arg0: i32, %arg1: i32) -> (i32, i32) {
    %c0_i32 = arith.constant 0 : i32
    %c0_i32_0 = arith.constant 0 : i32
    return %c0_i32, %arg1 : i32, i32
  }
  func.func @transform_4(%arg0: i32, %arg1: i32) -> (i32, i32) {
    %c0_i32 = arith.constant 0 : i32
    %c0_i32_0 = arith.constant 0 : i32
    return %c0_i32, %arg1 : i32, i32
  }
  func.func @transform_5(%arg0: i32, %arg1: i32) -> (i32, i32) {
    %c0_i32 = arith.constant 0 : i32
    return %arg0, %arg1 : i32, i32
  }
}

module attributes {stable_mosaic.version = 11 : i64} {
  func.func @_attn_block_kernel(%arg0: i32, %arg1: memref<8x32xf32, #tpu.memory_space<vmem>>, %arg2: memref<1x32xf32, #tpu.memory_space<vmem>>, %arg3: memref<1x32xf32, #tpu.memory_space<vmem>>, %arg4: memref<32x96xf32, #tpu.memory_space<vmem>>, %arg5: memref<1x96xf32, #tpu.memory_space<vmem>>, %arg6: memref<32x32xf32, #tpu.memory_space<vmem>>, %arg7: memref<1x32xf32, #tpu.memory_space<vmem>>, %arg8: memref<8x32xf32, #tpu.memory_space<vmem>>) attributes {dimension_semantics = [#tpu.dimension_semantics<parallel>], iteration_bounds = array<i64: 2>, scalar_prefetch = 0 : i64, scratch_operands = 0 : i64, tpu.core_type = #tpu.core_type<tc>, window_params = [{transform_indices = @transform_0, window_bounds = array<i64: 8, 32>}, {pipeline_mode = #tpu.pipeline_mode<synchronous>, transform_indices = @transform_1, window_bounds = array<i64: 1, 32>}, {pipeline_mode = #tpu.pipeline_mode<synchronous>, transform_indices = @transform_2, window_bounds = array<i64: 1, 32>}, {pipeline_mode = #tpu.pipeline_mode<synchronous>, transform_indices = @transform_3, window_bounds = array<i64: 32, 96>}, {pipeline_mode = #tpu.pipeline_mode<synchronous>, transform_indices = @transform_4, window_bounds = array<i64: 1, 96>}, {pipeline_mode = #tpu.pipeline_mode<synchronous>, transform_indices = @transform_5, window_bounds = array<i64: 32, 32>}, {pipeline_mode = #tpu.pipeline_mode<synchronous>, transform_indices = @transform_6, window_bounds = array<i64: 1, 32>}, {transform_indices = @transform_7, window_bounds = array<i64: 8, 32>}]} {
    %c0 = arith.constant 0 : index
    %c0_0 = arith.constant 0 : index
    %0 = vector.load %arg1[%c0, %c0_0] : memref<8x32xf32, #tpu.memory_space<vmem>>, vector<8x32xf32>
    %c0_1 = arith.constant 0 : index
    %c0_2 = arith.constant 0 : index
    %1 = vector.load %arg2[%c0_1, %c0_2] : memref<1x32xf32, #tpu.memory_space<vmem>>, vector<1x32xf32>
    %c0_3 = arith.constant 0 : index
    %c0_4 = arith.constant 0 : index
    %2 = vector.load %arg3[%c0_3, %c0_4] : memref<1x32xf32, #tpu.memory_space<vmem>>, vector<1x32xf32>
    %cst = arith.constant dense<0.000000e+00> : vector<8xf32>
    %3 = vector.multi_reduction <add>, %0, %cst [1] : vector<8x32xf32> to vector<8xf32>
    %4 = vector.shape_cast %3 : vector<8xf32> to vector<8x1xf32>
    %cst_5 = arith.constant 3.200000e+01 : f32
    %5 = vector.broadcast %cst_5 : f32 to vector<8x1xf32>
    %6 = arith.divf %4, %5 : vector<8x1xf32>
    %7 = vector.broadcast %6 : vector<8x1xf32> to vector<8x32xf32>
    %8 = arith.subf %0, %7 : vector<8x32xf32>
    %9 = arith.mulf %8, %8 : vector<8x32xf32>
    %cst_6 = arith.constant dense<0.000000e+00> : vector<8xf32>
    %10 = vector.multi_reduction <add>, %9, %cst_6 [1] : vector<8x32xf32> to vector<8xf32>
    %11 = vector.shape_cast %10 : vector<8xf32> to vector<8x1xf32>
    %cst_7 = arith.constant 3.200000e+01 : f32
    %12 = vector.broadcast %cst_7 : f32 to vector<8x1xf32>
    %13 = arith.divf %11, %12 : vector<8x1xf32>
    %cst_8 = arith.constant 9.99999974E-6 : f32
    %14 = vector.broadcast %cst_8 : f32 to vector<8x1xf32>
    %15 = arith.addf %13, %14 : vector<8x1xf32>
    %16 = math.rsqrt %15 : vector<8x1xf32>
    %17 = vector.broadcast %16 : vector<8x1xf32> to vector<8x32xf32>
    %18 = arith.mulf %8, %17 : vector<8x32xf32>
    %19 = vector.broadcast %1 : vector<1x32xf32> to vector<8x32xf32>
    %20 = arith.mulf %18, %19 : vector<8x32xf32>
    %21 = vector.broadcast %2 : vector<1x32xf32> to vector<8x32xf32>
    %22 = arith.addf %20, %21 : vector<8x32xf32>
    %23 = arith.truncf %22 : vector<8x32xf32> to vector<8x32xbf16>
    %c0_9 = arith.constant 0 : index
    %c0_10 = arith.constant 0 : index
    %24 = vector.load %arg4[%c0_9, %c0_10] : memref<32x96xf32, #tpu.memory_space<vmem>>, vector<32x96xf32>
    %25 = arith.truncf %24 : vector<32x96xf32> to vector<32x96xbf16>
    %cst_11 = arith.constant dense<0.000000e+00> : vector<8x96xf32>
    %26 = tpu.matmul %23, %25, %cst_11 {dimension_numbers = #tpu.dot_dimension_numbers<[1], [0], [0], [1], [0, 0, 1, 1], [], []>} : vector<8x32xbf16>, vector<32x96xbf16>, vector<8x96xf32> -> vector<8x96xf32>
    %c0_12 = arith.constant 0 : index
    %c0_13 = arith.constant 0 : index
    %27 = vector.load %arg5[%c0_12, %c0_13] : memref<1x96xf32, #tpu.memory_space<vmem>>, vector<1x96xf32>
    %28 = vector.broadcast %27 : vector<1x96xf32> to vector<8x96xf32>
    %29 = arith.addf %26, %28 : vector<8x96xf32>
    %30 = vector.extract_strided_slice %29 {offsets = [0, 0], sizes = [8, 8], strides = [1, 1]} : vector<8x96xf32> to vector<8x8xf32>
    %31 = arith.truncf %30 : vector<8x8xf32> to vector<8x8xbf16>
    %32 = vector.extract_strided_slice %29 {offsets = [0, 32], sizes = [8, 8], strides = [1, 1]} : vector<8x96xf32> to vector<8x8xf32>
    %33 = arith.truncf %32 : vector<8x8xf32> to vector<8x8xbf16>
    %34 = vector.extract_strided_slice %29 {offsets = [0, 64], sizes = [8, 8], strides = [1, 1]} : vector<8x96xf32> to vector<8x8xf32>
    %35 = arith.truncf %34 : vector<8x8xf32> to vector<8x8xbf16>
    %cst_14 = arith.constant dense<0.000000e+00> : vector<8x8xf32>
    %36 = tpu.matmul %31, %33, %cst_14 {dimension_numbers = #tpu.dot_dimension_numbers<[1], [1], [0], [0], [0, 0, 1, 0], [], []>} : vector<8x8xbf16>, vector<8x8xbf16>, vector<8x8xf32> -> vector<8x8xf32>
    %cst_15 = arith.constant 0.353553385 : f32
    %37 = vector.broadcast %cst_15 : f32 to vector<8x8xf32>
    %38 = arith.mulf %36, %37 : vector<8x8xf32>
    %cst_16 = arith.constant dense<0xFF800000> : vector<8xf32>
    %39 = vector.multi_reduction <maximumf>, %38, %cst_16 [1] : vector<8x8xf32> to vector<8xf32>
    %40 = vector.shape_cast %39 : vector<8xf32> to vector<8x1xf32>
    %41 = vector.broadcast %40 : vector<8x1xf32> to vector<8x8xf32>
    %42 = arith.subf %38, %41 : vector<8x8xf32>
    %43 = math.exp %42 : vector<8x8xf32>
    %cst_17 = arith.constant dense<0.000000e+00> : vector<8xf32>
    %44 = vector.multi_reduction <add>, %43, %cst_17 [1] : vector<8x8xf32> to vector<8xf32>
    %45 = vector.shape_cast %44 : vector<8xf32> to vector<8x1xf32>
    %46 = tpu.reciprocal %45 {approx = true} : vector<8x1xf32> -> vector<8x1xf32>
    %47 = vector.broadcast %46 : vector<8x1xf32> to vector<8x8xf32>
    %48 = arith.mulf %43, %47 : vector<8x8xf32>
    %49 = arith.truncf %48 : vector<8x8xf32> to vector<8x8xbf16>
    %cst_18 = arith.constant dense<0.000000e+00> : vector<8x8xf32>
    %50 = tpu.matmul %49, %35, %cst_18 {dimension_numbers = #tpu.dot_dimension_numbers<[1], [0], [0], [1], [0, 0, 1, 1], [], []>} : vector<8x8xbf16>, vector<8x8xbf16>, vector<8x8xf32> -> vector<8x8xf32>
    %51 = vector.extract_strided_slice %29 {offsets = [0, 8], sizes = [8, 8], strides = [1, 1]} : vector<8x96xf32> to vector<8x8xf32>
    %52 = arith.truncf %51 : vector<8x8xf32> to vector<8x8xbf16>
    %53 = vector.extract_strided_slice %29 {offsets = [0, 40], sizes = [8, 8], strides = [1, 1]} : vector<8x96xf32> to vector<8x8xf32>
    %54 = arith.truncf %53 : vector<8x8xf32> to vector<8x8xbf16>
    %55 = vector.extract_strided_slice %29 {offsets = [0, 72], sizes = [8, 8], strides = [1, 1]} : vector<8x96xf32> to vector<8x8xf32>
    %56 = arith.truncf %55 : vector<8x8xf32> to vector<8x8xbf16>
    %cst_19 = arith.constant dense<0.000000e+00> : vector<8x8xf32>
    %57 = tpu.matmul %52, %54, %cst_19 {dimension_numbers = #tpu.dot_dimension_numbers<[1], [1], [0], [0], [0, 0, 1, 0], [], []>} : vector<8x8xbf16>, vector<8x8xbf16>, vector<8x8xf32> -> vector<8x8xf32>
    %cst_20 = arith.constant 0.353553385 : f32
    %58 = vector.broadcast %cst_20 : f32 to vector<8x8xf32>
    %59 = arith.mulf %57, %58 : vector<8x8xf32>
    %cst_21 = arith.constant dense<0xFF800000> : vector<8xf32>
    %60 = vector.multi_reduction <maximumf>, %59, %cst_21 [1] : vector<8x8xf32> to vector<8xf32>
    %61 = vector.shape_cast %60 : vector<8xf32> to vector<8x1xf32>
    %62 = vector.broadcast %61 : vector<8x1xf32> to vector<8x8xf32>
    %63 = arith.subf %59, %62 : vector<8x8xf32>
    %64 = math.exp %63 : vector<8x8xf32>
    %cst_22 = arith.constant dense<0.000000e+00> : vector<8xf32>
    %65 = vector.multi_reduction <add>, %64, %cst_22 [1] : vector<8x8xf32> to vector<8xf32>
    %66 = vector.shape_cast %65 : vector<8xf32> to vector<8x1xf32>
    %67 = tpu.reciprocal %66 {approx = true} : vector<8x1xf32> -> vector<8x1xf32>
    %68 = vector.broadcast %67 : vector<8x1xf32> to vector<8x8xf32>
    %69 = arith.mulf %64, %68 : vector<8x8xf32>
    %70 = arith.truncf %69 : vector<8x8xf32> to vector<8x8xbf16>
    %cst_23 = arith.constant dense<0.000000e+00> : vector<8x8xf32>
    %71 = tpu.matmul %70, %56, %cst_23 {dimension_numbers = #tpu.dot_dimension_numbers<[1], [0], [0], [1], [0, 0, 1, 1], [], []>} : vector<8x8xbf16>, vector<8x8xbf16>, vector<8x8xf32> -> vector<8x8xf32>
    %72 = vector.extract_strided_slice %29 {offsets = [0, 16], sizes = [8, 8], strides = [1, 1]} : vector<8x96xf32> to vector<8x8xf32>
    %73 = arith.truncf %72 : vector<8x8xf32> to vector<8x8xbf16>
    %74 = vector.extract_strided_slice %29 {offsets = [0, 48], sizes = [8, 8], strides = [1, 1]} : vector<8x96xf32> to vector<8x8xf32>
    %75 = arith.truncf %74 : vector<8x8xf32> to vector<8x8xbf16>
    %76 = vector.extract_strided_slice %29 {offsets = [0, 80], sizes = [8, 8], strides = [1, 1]} : vector<8x96xf32> to vector<8x8xf32>
    %77 = arith.truncf %76 : vector<8x8xf32> to vector<8x8xbf16>
    %cst_24 = arith.constant dense<0.000000e+00> : vector<8x8xf32>
    %78 = tpu.matmul %73, %75, %cst_24 {dimension_numbers = #tpu.dot_dimension_numbers<[1], [1], [0], [0], [0, 0, 1, 0], [], []>} : vector<8x8xbf16>, vector<8x8xbf16>, vector<8x8xf32> -> vector<8x8xf32>
    %cst_25 = arith.constant 0.353553385 : f32
    %79 = vector.broadcast %cst_25 : f32 to vector<8x8xf32>
    %80 = arith.mulf %78, %79 : vector<8x8xf32>
    %cst_26 = arith.constant dense<0xFF800000> : vector<8xf32>
    %81 = vector.multi_reduction <maximumf>, %80, %cst_26 [1] : vector<8x8xf32> to vector<8xf32>
    %82 = vector.shape_cast %81 : vector<8xf32> to vector<8x1xf32>
    %83 = vector.broadcast %82 : vector<8x1xf32> to vector<8x8xf32>
    %84 = arith.subf %80, %83 : vector<8x8xf32>
    %85 = math.exp %84 : vector<8x8xf32>
    %cst_27 = arith.constant dense<0.000000e+00> : vector<8xf32>
    %86 = vector.multi_reduction <add>, %85, %cst_27 [1] : vector<8x8xf32> to vector<8xf32>
    %87 = vector.shape_cast %86 : vector<8xf32> to vector<8x1xf32>
    %88 = tpu.reciprocal %87 {approx = true} : vector<8x1xf32> -> vector<8x1xf32>
    %89 = vector.broadcast %88 : vector<8x1xf32> to vector<8x8xf32>
    %90 = arith.mulf %85, %89 : vector<8x8xf32>
    %91 = arith.truncf %90 : vector<8x8xf32> to vector<8x8xbf16>
    %cst_28 = arith.constant dense<0.000000e+00> : vector<8x8xf32>
    %92 = tpu.matmul %91, %77, %cst_28 {dimension_numbers = #tpu.dot_dimension_numbers<[1], [0], [0], [1], [0, 0, 1, 1], [], []>} : vector<8x8xbf16>, vector<8x8xbf16>, vector<8x8xf32> -> vector<8x8xf32>
    %93 = vector.extract_strided_slice %29 {offsets = [0, 24], sizes = [8, 8], strides = [1, 1]} : vector<8x96xf32> to vector<8x8xf32>
    %94 = arith.truncf %93 : vector<8x8xf32> to vector<8x8xbf16>
    %95 = vector.extract_strided_slice %29 {offsets = [0, 56], sizes = [8, 8], strides = [1, 1]} : vector<8x96xf32> to vector<8x8xf32>
    %96 = arith.truncf %95 : vector<8x8xf32> to vector<8x8xbf16>
    %97 = vector.extract_strided_slice %29 {offsets = [0, 88], sizes = [8, 8], strides = [1, 1]} : vector<8x96xf32> to vector<8x8xf32>
    %98 = arith.truncf %97 : vector<8x8xf32> to vector<8x8xbf16>
    %cst_29 = arith.constant dense<0.000000e+00> : vector<8x8xf32>
    %99 = tpu.matmul %94, %96, %cst_29 {dimension_numbers = #tpu.dot_dimension_numbers<[1], [1], [0], [0], [0, 0, 1, 0], [], []>} : vector<8x8xbf16>, vector<8x8xbf16>, vector<8x8xf32> -> vector<8x8xf32>
    %cst_30 = arith.constant 0.353553385 : f32
    %100 = vector.broadcast %cst_30 : f32 to vector<8x8xf32>
    %101 = arith.mulf %99, %100 : vector<8x8xf32>
    %cst_31 = arith.constant dense<0xFF800000> : vector<8xf32>
    %102 = vector.multi_reduction <maximumf>, %101, %cst_31 [1] : vector<8x8xf32> to vector<8xf32>
    %103 = vector.shape_cast %102 : vector<8xf32> to vector<8x1xf32>
    %104 = vector.broadcast %103 : vector<8x1xf32> to vector<8x8xf32>
    %105 = arith.subf %101, %104 : vector<8x8xf32>
    %106 = math.exp %105 : vector<8x8xf32>
    %cst_32 = arith.constant dense<0.000000e+00> : vector<8xf32>
    %107 = vector.multi_reduction <add>, %106, %cst_32 [1] : vector<8x8xf32> to vector<8xf32>
    %108 = vector.shape_cast %107 : vector<8xf32> to vector<8x1xf32>
    %109 = tpu.reciprocal %108 {approx = true} : vector<8x1xf32> -> vector<8x1xf32>
    %110 = vector.broadcast %109 : vector<8x1xf32> to vector<8x8xf32>
    %111 = arith.mulf %106, %110 : vector<8x8xf32>
    %112 = arith.truncf %111 : vector<8x8xf32> to vector<8x8xbf16>
    %cst_33 = arith.constant dense<0.000000e+00> : vector<8x8xf32>
    %113 = tpu.matmul %112, %98, %cst_33 {dimension_numbers = #tpu.dot_dimension_numbers<[1], [0], [0], [1], [0, 0, 1, 1], [], []>} : vector<8x8xbf16>, vector<8x8xbf16>, vector<8x8xf32> -> vector<8x8xf32>
    %114 = tpu.concatenate %50, %71, %92, %113 in 1 : vector<8x8xf32>, vector<8x8xf32>, vector<8x8xf32>, vector<8x8xf32> -> vector<8x32xf32>
    %115 = arith.truncf %114 : vector<8x32xf32> to vector<8x32xbf16>
    %c0_34 = arith.constant 0 : index
    %c0_35 = arith.constant 0 : index
    %116 = vector.load %arg6[%c0_34, %c0_35] : memref<32x32xf32, #tpu.memory_space<vmem>>, vector<32x32xf32>
    %117 = arith.truncf %116 : vector<32x32xf32> to vector<32x32xbf16>
    %cst_36 = arith.constant dense<0.000000e+00> : vector<8x32xf32>
    %118 = tpu.matmul %115, %117, %cst_36 {dimension_numbers = #tpu.dot_dimension_numbers<[1], [0], [0], [1], [0, 0, 1, 1], [], []>} : vector<8x32xbf16>, vector<32x32xbf16>, vector<8x32xf32> -> vector<8x32xf32>
    %c0_37 = arith.constant 0 : index
    %c0_38 = arith.constant 0 : index
    %119 = vector.load %arg7[%c0_37, %c0_38] : memref<1x32xf32, #tpu.memory_space<vmem>>, vector<1x32xf32>
    %120 = vector.broadcast %119 : vector<1x32xf32> to vector<8x32xf32>
    %121 = arith.addf %118, %120 : vector<8x32xf32>
    %122 = arith.addf %0, %121 : vector<8x32xf32>
    %c0_39 = arith.constant 0 : index
    %c0_40 = arith.constant 0 : index
    %123 = vector.load %arg8[%c0_39, %c0_40] : memref<8x32xf32, #tpu.memory_space<vmem>>, vector<8x32xf32>
    tpu.vector_store %arg8[%c0_39, %c0_40], %122 {strides = array<i32>} : memref<8x32xf32, #tpu.memory_space<vmem>>, vector<8x32xf32>,
    return
  }
  func.func @transform_0(%arg0: i32) -> (i32, i32) {
    %c0_i32 = arith.constant 0 : i32
    %c0_i32_0 = arith.constant 0 : i32
    return %arg0, %c0_i32 : i32, i32
  }
  func.func @transform_1(%arg0: i32) -> (i32, i32) {
    %c0_i32 = arith.constant 0 : i32
    %c0_i32_0 = arith.constant 0 : i32
    %c0_i32_1 = arith.constant 0 : i32
    return %c0_i32, %c0_i32_0 : i32, i32
  }
  func.func @transform_2(%arg0: i32) -> (i32, i32) {
    %c0_i32 = arith.constant 0 : i32
    %c0_i32_0 = arith.constant 0 : i32
    %c0_i32_1 = arith.constant 0 : i32
    return %c0_i32, %c0_i32_0 : i32, i32
  }
  func.func @transform_3(%arg0: i32) -> (i32, i32) {
    %c0_i32 = arith.constant 0 : i32
    %c0_i32_0 = arith.constant 0 : i32
    %c0_i32_1 = arith.constant 0 : i32
    return %c0_i32, %c0_i32_0 : i32, i32
  }
  func.func @transform_4(%arg0: i32) -> (i32, i32) {
    %c0_i32 = arith.constant 0 : i32
    %c0_i32_0 = arith.constant 0 : i32
    %c0_i32_1 = arith.constant 0 : i32
    return %c0_i32, %c0_i32_0 : i32, i32
  }
  func.func @transform_5(%arg0: i32) -> (i32, i32) {
    %c0_i32 = arith.constant 0 : i32
    %c0_i32_0 = arith.constant 0 : i32
    %c0_i32_1 = arith.constant 0 : i32
    return %c0_i32, %c0_i32_0 : i32, i32
  }
  func.func @transform_6(%arg0: i32) -> (i32, i32) {
    %c0_i32 = arith.constant 0 : i32
    %c0_i32_0 = arith.constant 0 : i32
    %c0_i32_1 = arith.constant 0 : i32
    return %c0_i32, %c0_i32_0 : i32, i32
  }
  func.func @transform_7(%arg0: i32) -> (i32, i32) {
    %c0_i32 = arith.constant 0 : i32
    %c0_i32_0 = arith.constant 0 : i32
    return %arg0, %c0_i32 : i32, i32
  }
}

module attributes {stable_mosaic.version = 11 : i64} {
  func.func @_ffn_block_kernel(%arg0: i32, %arg1: memref<16x32xf32, #tpu.memory_space<vmem>>, %arg2: memref<1x32xf32, #tpu.memory_space<vmem>>, %arg3: memref<1x32xf32, #tpu.memory_space<vmem>>, %arg4: memref<32x128xf32, #tpu.memory_space<vmem>>, %arg5: memref<1x128xf32, #tpu.memory_space<vmem>>, %arg6: memref<128x32xf32, #tpu.memory_space<vmem>>, %arg7: memref<1x32xf32, #tpu.memory_space<vmem>>, %arg8: memref<16x32xf32, #tpu.memory_space<vmem>>) attributes {dimension_semantics = [#tpu.dimension_semantics<parallel>], iteration_bounds = array<i64: 1>, scalar_prefetch = 0 : i64, scratch_operands = 0 : i64, tpu.core_type = #tpu.core_type<tc>, window_params = [{transform_indices = @transform_0, window_bounds = array<i64: 16, 32>}, {pipeline_mode = #tpu.pipeline_mode<synchronous>, transform_indices = @transform_1, window_bounds = array<i64: 1, 32>}, {pipeline_mode = #tpu.pipeline_mode<synchronous>, transform_indices = @transform_2, window_bounds = array<i64: 1, 32>}, {pipeline_mode = #tpu.pipeline_mode<synchronous>, transform_indices = @transform_3, window_bounds = array<i64: 32, 128>}, {pipeline_mode = #tpu.pipeline_mode<synchronous>, transform_indices = @transform_4, window_bounds = array<i64: 1, 128>}, {pipeline_mode = #tpu.pipeline_mode<synchronous>, transform_indices = @transform_5, window_bounds = array<i64: 128, 32>}, {pipeline_mode = #tpu.pipeline_mode<synchronous>, transform_indices = @transform_6, window_bounds = array<i64: 1, 32>}, {transform_indices = @transform_7, window_bounds = array<i64: 16, 32>}]} {
    %c0 = arith.constant 0 : index
    %c0_0 = arith.constant 0 : index
    %0 = vector.load %arg1[%c0, %c0_0] : memref<16x32xf32, #tpu.memory_space<vmem>>, vector<16x32xf32>
    %c0_1 = arith.constant 0 : index
    %c0_2 = arith.constant 0 : index
    %1 = vector.load %arg2[%c0_1, %c0_2] : memref<1x32xf32, #tpu.memory_space<vmem>>, vector<1x32xf32>
    %c0_3 = arith.constant 0 : index
    %c0_4 = arith.constant 0 : index
    %2 = vector.load %arg3[%c0_3, %c0_4] : memref<1x32xf32, #tpu.memory_space<vmem>>, vector<1x32xf32>
    %cst = arith.constant dense<0.000000e+00> : vector<16xf32>
    %3 = vector.multi_reduction <add>, %0, %cst [1] : vector<16x32xf32> to vector<16xf32>
    %4 = vector.shape_cast %3 : vector<16xf32> to vector<16x1xf32>
    %cst_5 = arith.constant 3.200000e+01 : f32
    %5 = vector.broadcast %cst_5 : f32 to vector<16x1xf32>
    %6 = arith.divf %4, %5 : vector<16x1xf32>
    %7 = vector.broadcast %6 : vector<16x1xf32> to vector<16x32xf32>
    %8 = arith.subf %0, %7 : vector<16x32xf32>
    %9 = arith.mulf %8, %8 : vector<16x32xf32>
    %cst_6 = arith.constant dense<0.000000e+00> : vector<16xf32>
    %10 = vector.multi_reduction <add>, %9, %cst_6 [1] : vector<16x32xf32> to vector<16xf32>
    %11 = vector.shape_cast %10 : vector<16xf32> to vector<16x1xf32>
    %cst_7 = arith.constant 3.200000e+01 : f32
    %12 = vector.broadcast %cst_7 : f32 to vector<16x1xf32>
    %13 = arith.divf %11, %12 : vector<16x1xf32>
    %cst_8 = arith.constant 9.99999974E-6 : f32
    %14 = vector.broadcast %cst_8 : f32 to vector<16x1xf32>
    %15 = arith.addf %13, %14 : vector<16x1xf32>
    %16 = math.rsqrt %15 : vector<16x1xf32>
    %17 = vector.broadcast %16 : vector<16x1xf32> to vector<16x32xf32>
    %18 = arith.mulf %8, %17 : vector<16x32xf32>
    %19 = vector.broadcast %1 : vector<1x32xf32> to vector<16x32xf32>
    %20 = arith.mulf %18, %19 : vector<16x32xf32>
    %21 = vector.broadcast %2 : vector<1x32xf32> to vector<16x32xf32>
    %22 = arith.addf %20, %21 : vector<16x32xf32>
    %23 = arith.truncf %22 : vector<16x32xf32> to vector<16x32xbf16>
    %c0_9 = arith.constant 0 : index
    %c0_10 = arith.constant 0 : index
    %24 = vector.load %arg4[%c0_9, %c0_10] : memref<32x128xf32, #tpu.memory_space<vmem>>, vector<32x128xf32>
    %25 = arith.truncf %24 : vector<32x128xf32> to vector<32x128xbf16>
    %cst_11 = arith.constant dense<0.000000e+00> : vector<16x128xf32>
    %26 = tpu.matmul %23, %25, %cst_11 {dimension_numbers = #tpu.dot_dimension_numbers<[1], [0], [0], [1], [0, 0, 1, 1], [], []>} : vector<16x32xbf16>, vector<32x128xbf16>, vector<16x128xf32> -> vector<16x128xf32>
    %c0_12 = arith.constant 0 : index
    %c0_13 = arith.constant 0 : index
    %27 = vector.load %arg5[%c0_12, %c0_13] : memref<1x128xf32, #tpu.memory_space<vmem>>, vector<1x128xf32>
    %28 = vector.broadcast %27 : vector<1x128xf32> to vector<16x128xf32>
    %29 = arith.addf %26, %28 : vector<16x128xf32>
    %cst_14 = arith.constant 0.000000e+00 : f32
    %30 = vector.broadcast %cst_14 : f32 to vector<16x128xf32>
    %31 = arith.maximumf %29, %30 : vector<16x128xf32>
    %32 = arith.truncf %31 : vector<16x128xf32> to vector<16x128xbf16>
    %c0_15 = arith.constant 0 : index
    %c0_16 = arith.constant 0 : index
    %33 = vector.load %arg6[%c0_15, %c0_16] : memref<128x32xf32, #tpu.memory_space<vmem>>, vector<128x32xf32>
    %34 = arith.truncf %33 : vector<128x32xf32> to vector<128x32xbf16>
    %cst_17 = arith.constant dense<0.000000e+00> : vector<16x32xf32>
    %35 = tpu.matmul %32, %34, %cst_17 {dimension_numbers = #tpu.dot_dimension_numbers<[1], [0], [0], [1], [0, 0, 1, 1], [], []>} : vector<16x128xbf16>, vector<128x32xbf16>, vector<16x32xf32> -> vector<16x32xf32>
    %c0_18 = arith.constant 0 : index
    %c0_19 = arith.constant 0 : index
    %36 = vector.load %arg7[%c0_18, %c0_19] : memref<1x32xf32, #tpu.memory_space<vmem>>, vector<1x32xf32>
    %37 = vector.broadcast %36 : vector<1x32xf32> to vector<16x32xf32>
    %38 = arith.addf %35, %37 : vector<16x32xf32>
    %39 = arith.addf %0, %38 : vector<16x32xf32>
    %c0_20 = arith.constant 0 : index
    %c0_21 = arith.constant 0 : index
    %40 = vector.load %arg8[%c0_20, %c0_21] : memref<16x32xf32, #tpu.memory_space<vmem>>, vector<16x32xf32>
    tpu.vector_store %arg8[%c0_20, %c0_21], %39 {strides = array<i32>} : memref<16x32xf32, #tpu.memory_space<vmem>>, vector<16x32xf32>,
    return
  }
  func.func @transform_0(%arg0: i32) -> (i32, i32) {
    %c0_i32 = arith.constant 0 : i32
    %c0_i32_0 = arith.constant 0 : i32
    return %arg0, %c0_i32 : i32, i32
  }
  func.func @transform_1(%arg0: i32) -> (i32, i32) {
    %c0_i32 = arith.constant 0 : i32
    %c0_i32_0 = arith.constant 0 : i32
    %c0_i32_1 = arith.constant 0 : i32
    return %c0_i32, %c0_i32_0 : i32, i32
  }
  func.func @transform_2(%arg0: i32) -> (i32, i32) {
    %c0_i32 = arith.constant 0 : i32
    %c0_i32_0 = arith.constant 0 : i32
    %c0_i32_1 = arith.constant 0 : i32
    return %c0_i32, %c0_i32_0 : i32, i32
  }
  func.func @transform_3(%arg0: i32) -> (i32, i32) {
    %c0_i32 = arith.constant 0 : i32
    %c0_i32_0 = arith.constant 0 : i32
    %c0_i32_1 = arith.constant 0 : i32
    return %c0_i32, %c0_i32_0 : i32, i32
  }
  func.func @transform_4(%arg0: i32) -> (i32, i32) {
    %c0_i32 = arith.constant 0 : i32
    %c0_i32_0 = arith.constant 0 : i32
    %c0_i32_1 = arith.constant 0 : i32
    return %c0_i32, %c0_i32_0 : i32, i32
  }
  func.func @transform_5(%arg0: i32) -> (i32, i32) {
    %c0_i32 = arith.constant 0 : i32
    %c0_i32_0 = arith.constant 0 : i32
    %c0_i32_1 = arith.constant 0 : i32
    return %c0_i32, %c0_i32_0 : i32, i32
  }
  func.func @transform_6(%arg0: i32) -> (i32, i32) {
    %c0_i32 = arith.constant 0 : i32
    %c0_i32_0 = arith.constant 0 : i32
    %c0_i32_1 = arith.constant 0 : i32
    return %c0_i32, %c0_i32_0 : i32, i32
  }
  func.func @transform_7(%arg0: i32) -> (i32, i32) {
    %c0_i32 = arith.constant 0 : i32
    %c0_i32_0 = arith.constant 0 : i32
    return %arg0, %c0_i32 : i32, i32
  }
}

</mosaic_0001>

<bundles_post_ra>
// kernel: transformer_forward.10
= control target key start
LH: loop header
LB: loop body
LE: loop exit
PB: predicated region body
PF: predicated region fallthrough
CT: control target
= control target key end

     0   :  { %vm31_vm0 = vcmask 261120   ;;  %v186_v4 = vmov 32.0   ;;  %s338_s0 = inlined_call_operand.vmem [shape: f32[16,32], index: 0, kind: input, shape index: {}]   ;;  %s339_s1 = inlined_call_operand.vmem [shape: f32[1,32], index: 1, kind: input, shape index: {}]   ;;  %s340_s2 = inlined_call_operand.vmem [shape: f32[1,32], index: 2, kind: input, shape index: {}]   ;;  %s341_s4 = inlined_call_operand.vmem [shape: f32[1,128], index: 4, kind: input, shape index: {}]   ;;  %s342_s3 = inlined_call_operand.vmem [shape: f32[32,128], index: 3, kind: input, shape index: {}]   ;;  %s343_s5 = inlined_call_operand.vmem [shape: f32[128,32], index: 5, kind: input, shape index: {}]   ;;  %s344_s6 = inlined_call_operand.vmem [shape: f32[1,32], index: 6, kind: input, shape index: {}]   ;;  %s345_s7 = inlined_call_operand.vmem [shape: f32[16,32], index: 7, kind: output, shape index: {}]  }
   0x1   :  { %v230_v0 = vld [vmem:[%s338_s0] sm:$0xff]  ;;  %v237_v2 = vld [vmem:[%s338_s0 + $0x8] sm:$0xff]  ;;  %180 = vrcp.f32 %v186_v4  ;;  %v96_v21 = vld [vmem:[%s342_s3 + $0x10] sm:$0xff] }
   0x2   :  { %v32_v1 = vsel %vm31_vm0, %v230_v0, 0.0  ;;  %v35_v3 = vsel %vm31_vm0, %v237_v2, 0.0  ;;  %v97_v22 = vld [vmem:[%s342_s3 + $0x18] sm:$0xff]  ;;  %v94_v24 = vld [vmem:[%s342_s3] sm:$0xff]  ;;  %v95_v25 = vld [vmem:[%s342_s3 + $0x8] sm:$0xff] }
   0x3   :  { %33 = vadd.xlane.f32.xlu0 %v32_v1  ;;  %v99_v23 = vpack.c.bf16 %v97_v22, %v96_v21  ;;  %v98_v27 = vpack.c.bf16 %v95_v25, %v94_v24  ;;  %v138_v30 = vld [vmem:[%s343_s5 + $0x70] sm:$0xff]  ;;  %v139_v31 = vld [vmem:[%s343_s5 + $0x78] sm:$0xff]  ;;  %v136_v32 = vld [vmem:[%s343_s5 + $0x60] sm:$0xff] }
   0x4   :  { %v147_v34 = vpack.c.bf16 %v139_v31, %v138_v30  ;;  %v137_v35 = vld [vmem:[%s343_s5 + $0x68] sm:$0xff]  ;;  %v134_v40 = vld [vmem:[%s343_s5 + $0x50] sm:$0xff]  ;;  %v135_v41 = vld [vmem:[%s343_s5 + $0x58] sm:$0xff] }
   0x5   :  { %113 = vmatpush.bf16.msra.mxu0 %v99_v23  ;;  %v146_v37 = vpack.c.bf16 %v137_v35, %v136_v32  ;;  %v145_v44 = vpack.c.bf16 %v135_v41, %v134_v40  ;;  %v132_v45 = vld [vmem:[%s343_s5 + $0x40] sm:$0xff]  ;;  %v133_v46 = vld [vmem:[%s343_s5 + $0x48] sm:$0xff] }
   0x6   :  { %152 = vmatpush.bf16.msra.mxu1 %v147_v34  ;;  %v144_v49 = vpack.c.bf16 %v133_v46, %v132_v45  ;;  %v176_v58 = vld [vmem:[%s339_s1] ss:$0 sm:$0xff] }
   0x7   :  { %v181_v5 = vpop.eup %180  ;;  %v177_v63 = vld [vmem:[%s340_s2] ss:$0 sm:$0xff] }
   0x8   :  { %v39_v6 = vmul.f32 32.0, %v181_v5  ;;  %vm43_vm1 = vweird.f32 %v181_v5 }
   0x9   :  { %114 = vmatpush.bf16.msra.mxu0 %v98_v27 }
   0xa   :  { %v40_v7 = vsub.f32 1.0, %v39_v6  ;;  %153 = vmatpush.bf16.msra.mxu1 %v146_v37  ;;  %v130_v6 = vld [vmem:[%s343_s5 + $0x30] sm:$0xff] }
   0xb   :  { %36 = vadd.xlane.f32.xlu0 %v35_v3 }
   0xc   :  { %v41_v8 = vmul.f32 %v181_v5, %v40_v7  ;;  %v131_v7 = vld [vmem:[%s343_s5 + $0x38] sm:$0xff] }
   0xe   :  { %v42_v9 = vadd.f32 %v181_v5, %v41_v8  ;;  %154 = vmatpush.bf16.msra.mxu1 %v145_v44  ;;  %v143_v8 = vpack.c.bf16 %v131_v7, %v130_v6 }
  0x10   :  { %v44_v10 = vsel %vm43_vm1, %v181_v5, %v42_v9  ;;  %v128_v9 = vld [vmem:[%s343_s5 + $0x20] sm:$0xff] }
  0x12   :  { %155 = vmatpush.bf16.msra.mxu1 %v144_v49 }
  0x16   :  { %156 = vmatpush.bf16.msra.mxu1 %v143_v8 }
  0x76   :  { %v34_v11 = vpop.xlane.xlu0 %33 }
  0x77   :  { %v45_v12 = vmul.f32 %v44_v10, %v34_v11 }
  0x79   :  { %v242_v13 = vsub.f32 %v230_v0, %v45_v12  ;;  %v126_v12 = vld [vmem:[%s343_s5 + $0x10] sm:$0xff] }
  0x7b   :  { %v49_v14 = vmul.f32 %v242_v13, %v242_v13 }
  0x7d   :  { %v51_v15 = vsel %vm31_vm0, %v49_v14, 0.0 }
  0x7e   :  { %52 = vadd.xlane.f32.xlu1 %v51_v15  ;;  %v37_v16 = vpop.xlane.xlu0 %36  ;;  %v124_v15 = vld [vmem:[%s343_s5] sm:$0xff] }
  0x7f   :  { %v46_v17 = vmul.f32 %v44_v10, %v37_v16  ;;  %v125_v16 = vld [vmem:[%s343_s5 + $0x8] sm:$0xff] }
  0x81   :  { %v248_v18 = vsub.f32 %v237_v2, %v46_v17  ;;  %v140_v17 = vpack.c.bf16 %v125_v16, %v124_v15 }
  0x83   :  { %v50_v19 = vmul.f32 %v248_v18, %v248_v18 }
  0x85   :  { %v54_v20 = vsel %vm31_vm0, %v50_v19, 0.0  ;;  %v178_v19 = vld [vmem:[%s341_s4] ss:$0 sm:$0xff] }
  0x86   :  { %55 = vadd.xlane.f32.xlu1 %v54_v20 }
  0xf1   :  { %v53_v26 = vpop.xlane.xlu1 %52 }
  0xf2   :  { %v57_v28 = vmul.f32 %v53_v26, %v44_v10  ;;  %v179_v26 = vld [vmem:[%s344_s6] ss:$0 sm:$0xff] }
  0xf4   :  { %v59_v29 = vadd.f32 1e-05, %v57_v28 }
  0xf6   :  { %182 = vrsqrt.f32 %v59_v29  ;;  %vm67_vm3 = vweird.f32 %v59_v29 }
  0xf9   :  { %v56_v33 = vpop.xlane.xlu1 %55 }
  0xfa   :  { %v58_v36 = vmul.f32 %v56_v33, %v44_v10  ;;  %v129_v10 = vld [vmem:[%s343_s5 + $0x28] sm:$0xff] }
  0xfb   :  { %v142_v11 = vpack.c.bf16 %v129_v10, %v128_v9 }
  0xfc   :  { %v183_v38 = vpop.eup %182  ;;  %v60_v39 = vadd.f32 1e-05, %v58_v36 }
  0xfd   :  { %v62_v42 = vmul.f32 %v183_v38, %v59_v29  ;;  %vm68_vm2 = vweird.f32 %v183_v38  ;;  %157 = vmatpush.bf16.msra.mxu1 %v142_v11 }
  0xfe   :  { %184 = vrsqrt.f32 %v60_v39  ;;  %vm69_vm4 = vmor %vm67_vm3, %vm68_vm2  ;;  %vm77_vm6 = vweird.f32 %v60_v39 }
  0xff   :  { %v63_v43 = vmul.f32 %v183_v38, %v62_v42 }
 0x101   :  { %v64_v47 = vmul.f32 0.5, %v63_v43 }
 0x103   :  { %v65_v48 = vsub.f32 1.5, %v64_v47 }
 0x104   :  { %v185_v50 = vpop.eup %184 }
 0x105   :  { %v66_v51 = vmul.f32 %v183_v38, %v65_v48  ;;  %v72_v52 = vmul.f32 %v185_v50, %v60_v39  ;;  %vm78_vm5 = vweird.f32 %v185_v50 }
 0x106   :  { %vm79_vm7 = vmor %vm77_vm6, %vm78_vm5 }
 0x107   :  { %v73_v53 = vmul.f32 %v185_v50, %v72_v52  ;;  %v70_v54 = vsel %vm69_vm4, %v183_v38, %v66_v51 }
 0x108   :  { %v81_v57 = vmul.f32 %v70_v54, %v242_v13  ;;  %v127_v13 = vld [vmem:[%s343_s5 + $0x18] sm:$0xff] }
 0x109   :  { %v74_v55 = vmul.f32 0.5, %v73_v53  ;;  %v141_v14 = vpack.c.bf16 %v127_v13, %v126_v12 }
 0x10a   :  { %v86_v62 = vmul.f32 %v176_v58, %v81_v57 }
 0x10b   :  { %v75_v56 = vsub.f32 1.5, %v74_v55  ;;  %158 = vmatpush.bf16.msra.mxu1 %v141_v14 }
 0x10c   :  { %v91_v3 = vadd.f32 %v177_v63, %v86_v62 }
 0x10d   :  { %v76_v59 = vmul.f32 %v185_v50, %v75_v56 }
 0x10f   :  { %v80_v60 = vsel %vm79_vm7, %v185_v50, %v76_v59  ;;  %159 = vmatpush.bf16.msra.mxu1 %v140_v17 }
 0x110   :  { %v82_v61 = vmul.f32 %v80_v60, %v248_v18 }
 0x112   :  { %v87_v1 = vmul.f32 %v176_v58, %v82_v61 }
 0x114   :  { %v92_v4 = vadd.f32 %v177_v63, %v87_v1 }
 0x116   :  { %v93_v5 = vpack.c.bf16 %v92_v4, %v91_v3 }
 0x118   :  { %174 = vmatmul.msk.bf16.vlgmr.msra.gmra.mxu0 %vm31_vm0, %v93_v5 }
 0x195   :  { %v116_v18 = vpop.f32.mrf.mxu0 }
 0x196   :  { %v117_v20 = vadd.f32 %v178_v19, %v116_v18 }
 0x198   :  { %v121_v23 = vmax.f32 %v117_v20, 0.0 }
 0x19d   :  { %v118_v21 = vpop.f32.mrf.mxu0 }
 0x19e   :  { %v119_v22 = vadd.f32 %v178_v19, %v118_v21 }
 0x1a0   :  { %v122_v24 = vmax.f32 %v119_v22, 0.0 }
 0x1a2   :  { %v123_v25 = vpack.c.bf16 %v122_v24, %v121_v23 }
 0x1a4   :  { %160 = vmatmul.bf16.vlgmr.msra.gmra.mxu1 %v123_v25 }
 0x221   :  { %v161_v27 = vpop.f32.mrf.mxu1 }
 0x222   :  { %v162_v28 = vadd.f32 %v179_v26, %v161_v27 }
 0x224   :  { %v166_v29 = vadd.f32 %v162_v28, %v230_v0 }
 0x226   :  { %168 = vst.msk [vmem:[%s345_s7] sm:$0xff] %vm31_vm0, %v166_v29 }
 0x229   :  { %v163_v30 = vpop.f32.mrf.mxu1 }
 0x22a   :  { %v164_v31 = vadd.f32 %v179_v26, %v163_v30 }
 0x22c   :  { %v167_v32 = vadd.f32 %v164_v31, %v237_v2 }
 0x22e   :  { %169 = vst.msk [vmem:[%s345_s7 + $0x8] sm:$0xff] %vm31_vm0, %v167_v32 }

// kernel: transformer_forward.17
= control target key start
LH: loop header
LB: loop body
LE: loop exit
PB: predicated region body
PF: predicated region fallthrough
CT: control target
= control target key end

     0   :  { %10 = vsyncpa [#allocation4], 0  ;;  %s985_s0 = inlined_call_operand.vmem [shape: f32[16,32], index: 0, kind: input, shape index: {}]   ;;  %s986_s1 = inlined_call_operand.vmem [shape: f32[1,32], index: 1, kind: input, shape index: {}]   ;;  %s987_s2 = inlined_call_operand.vmem [shape: f32[1,32], index: 2, kind: input, shape index: {}]   ;;  %s988_s3 = inlined_call_operand.vmem [shape: f32[32,1024], index: 3, kind: input, shape index: {}]   ;;  %s989_s4 = inlined_call_operand.vmem [shape: f32[1,1024], index: 4, kind: input, shape index: {}]   ;;  %s990_s5 = inlined_call_operand.hbm [shape: f32[16,1024], index: 5, kind: output, shape index: {}]  }
   0x1   :  { %12 = vsyncpa [#allocation4 + $0x1], 0  ;;  %s826_s18 = smov 0   ;;  %s828_s19 = smov 0  }
   0x2   :  { %s830_s20 = smov 0   ;;  %s832_s21 = smov 0  }
   0x3   :  { %s834_s22 = smov 0   ;;  %s836_s23 = smov 0  }
   0x4 LB: > { %s622_s24 = sadd.s32 4294967295, %s790_s23   ;;  %s623_s25 = sadd.s32 4294967294, %s790_s23   ;;  %s790_s23 = sphi %s836_s23, %s18_s23   ;;  %s786_s22 = sphi %s834_s22, %s997_s22   ;;  %s782_s21 = sphi %s832_s21, %s996_s21   ;;  %s778_s20 = sphi %s830_s20, %s995_s20   ;;  %s774_s19 = sphi %s828_s19, %s994_s19   ;;  %s770_s18 = sphi %s826_s18, %s993_s18  }
   0x5   : > { %s27_s26 = sadd.s32 1, %s786_s22  ;;  %s105_s27 = sadd.s32 1, %s778_s20 }
   0x6   : > { %p28_p0 = scmp.ge.s32.totalorder %s27_s26, 2  ;;  %p112_p1 = scmp.ne.s32.totalorder %s778_s20, %s774_s19 }
   0x7   : > { %p113_p2 = scmp.eq.s32.totalorder %s790_s23, 0  ;;  %p170_p3 = scmp.eq.s32.totalorder %s622_s24, 1 }
   0x8   : > { %s999_s26 = smov (%p28_p0, %s27_s26), 0  ;;  %p175_p6 = scmp.ne.s32.totalorder %s774_s19, %s770_s18 }
   0x9   : > { %p114_p4 = por %p113_p2, %p112_p1  ;;  %p865_p5 = por %p170_p3, %p112_p1 }
   0xa   : > { %s102_s29 = ssub.s32 %s786_s22, %s999_s26  ;;  %p176_p8 = scmp.eq.s32.totalorder %s623_s25, 1 }
   0xb   : > { %p103_p7 = scmp.eq.s32.totalorder %s102_s29, 0  ;;  %p626_p10 = scmp.ge.s32.totalorder %s790_s23, 2 }
   0xc   : > { %p876_p9 = por %p176_p8, %p175_p6 }
   0xd   : > { %s874_s30 = scalar_select %p103_p7, %s778_s20, %s105_s27  }
   0xe   : > { %207 = sbr.rel (%p626_p10) target bundleno = 39 (0x27), region = 28 }
  0x13   : > { %210 = sbr.rel (!%p114_p4) target bundleno = 39 (0x27), region = 32  ;;  %s212_s7 = sand.u32 (%p114_p4), 1, %s778_s20  }
  0x14   : > { %s643_s8 = sshll.u32 (%p114_p4), %s786_s22, 5  ;;  %s627_s9 = sshll.u32 (%p114_p4), %s212_s7, 7 }
  0x15   : > { %s888_s12 = scalar_lea.vmem (%p114_p4), %s988_s3, %s643_s8  ;;  %s214_s13 = scalar_lea.vmem (%p114_p4), [#allocation2], %s627_s9 }
  0x16   : > { %v230_v0 = vld [vmem:[%s888_s12] sm:$0xff] (%p114_p4)  ;;  %v232_v1 = vld [vmem:[%s888_s12 + $0x8] sm:$0xff] (%p114_p4)  ;;  %v234_v2 = vld [vmem:[%s888_s12 + $0x10] sm:$0xff] (%p114_p4) }
  0x17   : > { %231 = vst [vmem:[%s214_s13] sm:$0xff] (%p114_p4), %v230_v0  ;;  %v236_v3 = vld [vmem:[%s888_s12 + $0x18] sm:$0xff] (%p114_p4)  ;;  %v238_v4 = vld [vmem:[%s888_s12 + $0x40] sm:$0xff] (%p114_p4)  ;;  %v240_v5 = vld [vmem:[%s888_s12 + $0x48] sm:$0xff] (%p114_p4) }
  0x18   : > { %233 = vst [vmem:[%s214_s13 + $0x8] sm:$0xff] %v232_v1  ;;  %v242_v6 = vld [vmem:[%s888_s12 + $0x50] sm:$0xff]  ;;  %v244_v7 = vld [vmem:[%s888_s12 + $0x58] sm:$0xff]  ;;  %v246_v8 = vld [vmem:[%s888_s12 + $0x80] sm:$0xff] }
  0x19   : > { %235 = vst [vmem:[%s214_s13 + $0x10] sm:$0xff] %v234_v2  ;;  %v248_v9 = vld [vmem:[%s888_s12 + $0x88] sm:$0xff]  ;;  %v250_v10 = vld [vmem:[%s888_s12 + $0x90] sm:$0xff]  ;;  %v252_v11 = vld [vmem:[%s888_s12 + $0x98] sm:$0xff] }
  0x1a   : > { %237 = vst [vmem:[%s214_s13 + $0x18] sm:$0xff] %v236_v3  ;;  %v254_v12 = vld [vmem:[%s888_s12 + $0xc0] sm:$0xff]  ;;  %v256_v13 = vld [vmem:[%s888_s12 + $0xc8] sm:$0xff]  ;;  %v258_v14 = vld [vmem:[%s888_s12 + $0xd0] sm:$0xff] }
  0x1b   : > { %239 = vst [vmem:[%s214_s13 + $0x20] sm:$0xff] %v238_v4  ;;  %v260_v15 = vld [vmem:[%s888_s12 + $0xd8] sm:$0xff] }
  0x1c   : > { %241 = vst [vmem:[%s214_s13 + $0x28] sm:$0xff] %v240_v5 }
  0x1d   : > { %243 = vst [vmem:[%s214_s13 + $0x30] sm:$0xff] %v242_v6 }
  0x1e   : > { %245 = vst [vmem:[%s214_s13 + $0x38] sm:$0xff] %v244_v7 }
  0x1f   : > { %247 = vst [vmem:[%s214_s13 + $0x40] sm:$0xff] %v246_v8 }
  0x20   : > { %249 = vst [vmem:[%s214_s13 + $0x48] sm:$0xff] %v248_v9 }
  0x21   : > { %251 = vst [vmem:[%s214_s13 + $0x50] sm:$0xff] %v250_v10 }
  0x22   : > { %253 = vst [vmem:[%s214_s13 + $0x58] sm:$0xff] %v252_v11 }
  0x23   : > { %255 = vst [vmem:[%s214_s13 + $0x60] sm:$0xff] %v254_v12 }
  0x24   : > { %257 = vst [vmem:[%s214_s13 + $0x68] sm:$0xff] %v256_v13 }
  0x25   : > { %259 = vst [vmem:[%s214_s13 + $0x70] sm:$0xff] %v258_v14 }
  0x26   : > { %261 = vst [vmem:[%s214_s13 + $0x78] sm:$0xff] %v260_v15 }
  0x27 PF: > { %p630_p11 = scmp.ge.s32.totalorder %s790_s23, 1  ;;  %p274_p12 = scmp.lt.s32.totalorder %s790_s23, 3 }
  0x29   : > { %p275_p13 = pnand %p630_p11, %p274_p12 }
  0x2a   : > { %s927_s24 = sand.u32 (!%p275_p13), 1, %s774_s19   ;;  %s633_s10 = sshll.u32 (!%p275_p13), %s782_s21, 2 }
  0x2b   : > { %278 = sbr.rel (%p275_p13) target bundleno = 476 (0x1dc), region = 59  ;;  %s631_s25 = sshll.u32 (!%p275_p13), %s927_s24, 7 }
  0x2c   : > { %s283_s27 = scalar_lea.vmem (!%p275_p13), [#allocation2], %s631_s25  ;;  %p325_p0 = scmp.lt.s32.totalorder (!%p275_p13), %s633_s10, 7 }
  0x2d   : > { %s632_s14 = sshll.u32 (!%p275_p13), %s927_s24, 6  ;;  %s644_s16 = sshll.u32 (!%p275_p13), %s782_s21, 5 }
  0x2e   : > { %s316_s15 = scalar_lea.vmem (!%p275_p13), [#allocation3], %s632_s14  ;;  %s501_s21 = scalar_lea.sflag (!%p275_p13), [#allocation4], %s927_s24 }
  0x2f   : > { %s516_s29 = sshll.u32 (!%p275_p13), %s316_s15, 4  ;;  %s732_s12 = scalar_lea.hbm (!%p275_p13), %s990_s5, 128  ;;  %s517_s29 = int_to_ptr.vmem [resolvable:$true] %s516_s29 }
  0x30   : > { %v332_v16 = vld [vmem:[%s985_s0] sm:$0xff]  ;;  %vm336_vm0 = vcmask 261120   ;;  %v333_v18 = vld [vmem:[%s985_s0 + $0x8] sm:$0xff]  ;;  %v792_v20 = vmov 32.0   ;;  %v409_v42 = vld [vmem:[%s283_s27 + $0x50] sm:$0xff]  ;;  %s1001_s10 = smov (!%p325_p0, %s633_s10), 7 }
  0x31   : > { %v337_v17 = vsel %vm336_vm0, %v332_v16, 0.0  ;;  %v340_v19 = vsel %vm336_vm0, %v333_v18, 0.0  ;;  %706 = vrcp.f32 %v792_v20  ;;  %v407_v37 = vld [vmem:[%s283_s27 + $0x40] sm:$0xff]  ;;  %v408_v39 = vld [vmem:[%s283_s27 + $0x48] sm:$0xff]  ;;  %v413_v43 = vld [vmem:[%s283_s27 + $0x70] sm:$0xff]  ;;  %s327_s13 = scalar_lea.vmem %s989_s4, %s1001_s10 }
  0x32   : > { %338 = vadd.xlane.f32.xlu0 %v337_v17  ;;  %v411_v38 = vld [vmem:[%s283_s27 + $0x60] sm:$0xff]  ;;  %v412_v41 = vld [vmem:[%s283_s27 + $0x68] sm:$0xff]  ;;  %v421_v45 = vpack.c.bf16 %v413_v43, %v409_v42  ;;  %v410_v46 = vld [vmem:[%s283_s27 + $0x58] sm:$0xff] }
  0x33   : > { %v419_v40 = vpack.c.bf16 %v411_v38, %v407_v37  ;;  %v420_v44 = vpack.c.bf16 %v412_v41, %v408_v39  ;;  %v414_v47 = vld [vmem:[%s283_s27 + $0x78] sm:$0xff]  ;;  %v399_v48 = vld [vmem:[%s283_s27] sm:$0xff]  ;;  %v400_v52 = vld [vmem:[%s283_s27 + $0x8] sm:$0xff] }
  0x34   : > { %v422_v50 = vpack.c.bf16 %v414_v47, %v410_v46  ;;  %v403_v51 = vld [vmem:[%s283_s27 + $0x20] sm:$0xff]  ;;  %v404_v53 = vld [vmem:[%s283_s27 + $0x28] sm:$0xff]  ;;  %470 = vmatpush.bf16.msra.mxu2 %v421_v45  ;;  %v401_v57 = vld [vmem:[%s283_s27 + $0x10] sm:$0xff] }
  0x35   : > { %442 = vmatpush.bf16.msra.mxu0 %v419_v40  ;;  %456 = vmatpush.bf16.msra.mxu1 %v420_v44  ;;  %v415_v55 = vpack.c.bf16 %v403_v51, %v399_v48  ;;  %v416_v56 = vpack.c.bf16 %v404_v53, %v400_v52  ;;  %v405_v58 = vld [vmem:[%s283_s27 + $0x30] sm:$0xff]  ;;  %v402_v59 = vld [vmem:[%s283_s27 + $0x18] sm:$0xff] }
  0x36   : > { %484 = vmatpush.bf16.msra.mxu3 %v422_v50  ;;  %v417_v60 = vpack.c.bf16 %v405_v58, %v401_v57  ;;  %v406_v61 = vld [vmem:[%s283_s27 + $0x38] sm:$0xff]  ;;  %s515_s27 = scalar_lea.hbm %s990_s5, %s644_s16 }
  0x37   : > { %v707_v21 = vpop.eup %706  ;;  %v418_v63 = vpack.c.bf16 %v406_v61, %v402_v59  ;;  %s518_s7 = sshll.u32 %s515_s27, 4  ;;  %s519_s7 = int_to_ptr.hbm [resolvable:$true] %s518_s7 }
  0x38   : > { %v344_v22 = vmul.f32 32.0, %v707_v21  ;;  %vm348_vm1 = vweird.f32 %v707_v21  ;;  %471 = vmatpush.bf16.msra.mxu2 %v417_v60  ;;  %s726_s8 = sshra.s32 %s519_s7, 4  ;;  %s727_s8 = int_to_ptr.hbm [resolvable:$true] %s726_s8 }
  0x39   : > { %443 = vmatpush.bf16.msra.mxu0 %v415_v55  ;;  %457 = vmatpush.bf16.msra.mxu1 %v416_v56  ;;  %s728_s9 = scalar_lea.hbm %s727_s8, 64  ;;  %p733_p4 = scmp.lt.s32.totalorder %s727_s8, %s990_s5 }
  0x3a   : > { %341 = vadd.xlane.f32.xlu0 %v340_v19  ;;  %v345_v23 = vsub.f32 1.0, %v344_v22  ;;  %485 = vmatpush.bf16.msra.mxu3 %v418_v63  ;;  %p729_p1 = scmp.ne.s32.totalorder %s727_s8, %s728_s9  ;;  %p734_p6 = scmp.lt.s32.totalorder %s732_s12, %s728_s9 }
  0x3c   : > { %v346_v24 = vmul.f32 %v707_v21, %v345_v23  ;;  %p730_p2 = pnand %p729_p1, %p865_p5  ;;  %p735_p7 = por %p734_p6, %p733_p4 }
  0x3e   : > { %v347_v25 = vadd.f32 %v707_v21, %v346_v24  ;;  %p731_p3 = pneg %p730_p2 }
  0x40   : > { %v349_v26 = vsel %vm348_vm1, %v707_v21, %v347_v25  ;;  %v705_v21 = vld [vmem:[%s987_s2] ss:$0 sm:$0xff]  ;;  %p736_p8 = pnand %p735_p7, %p731_p3 }
  0xa5   : > { %v339_v27 = vpop.xlane.xlu0 %338 }
  0xa6   : > { %v350_v28 = vmul.f32 %v349_v26, %v339_v27 }
  0xa8   : > { %v916_v29 = vsub.f32 %v332_v16, %v350_v28  ;;  %v704_v16 = vld [vmem:[%s986_s1] ss:$0 sm:$0xff] }
  0xaa   : > { %v354_v30 = vmul.f32 %v916_v29, %v916_v29 }
  0xac   : > { %v356_v31 = vsel %vm336_vm0, %v354_v30, 0.0 }
  0xad   : > { %357 = vadd.xlane.f32.xlu1 %v356_v31  ;;  %v342_v32 = vpop.xlane.xlu0 %341 }
  0xae   : > { %v351_v33 = vmul.f32 %v349_v26, %v342_v32 }
  0xb0   : > { %v921_v34 = vsub.f32 %v333_v18, %v351_v33 }
  0xb2   : > { %v355_v35 = vmul.f32 %v921_v34, %v921_v34 }
  0xb4   : > { %v359_v36 = vsel %vm336_vm0, %v355_v35, 0.0 }
  0xb5   : > { %360 = vadd.xlane.f32.xlu1 %v359_v36 }
 0x120   : > { %v358_v49 = vpop.xlane.xlu1 %357 }
 0x121   : > { %v362_v54 = vmul.f32 %v358_v49, %v349_v26 }
 0x123   : > { %v364_v62 = vadd.f32 1e-05, %v362_v54 }
 0x125   : > { %708 = vrsqrt.f32 %v364_v62  ;;  %vm372_vm3 = vweird.f32 %v364_v62 }
 0x128   : > { %v361_v0 = vpop.xlane.xlu1 %360 }
 0x129   : > { %v363_v1 = vmul.f32 %v361_v0, %v349_v26  ;;  %v423_v26 = vld [vmem:[%s327_s13] sm:$0xf] }
 0x12a   : > { %v425_v27 = vperm.slane %v423_v26, 0  ;;  %v426_v28 = vperm.slane %v423_v26, 1  ;;  %v427_v33 = vperm.slane %v423_v26, 2 }
 0x12b   : > { %v709_v2 = vpop.eup %708  ;;  %v365_v3 = vadd.f32 1e-05, %v363_v1 }
 0x12c   : > { %v367_v4 = vmul.f32 %v709_v2, %v364_v62  ;;  %vm373_vm2 = vweird.f32 %v709_v2 }
 0x12d   : > { %710 = vrsqrt.f32 %v365_v3  ;;  %vm374_vm4 = vmor %vm372_vm3, %vm373_vm2  ;;  %vm382_vm6 = vweird.f32 %v365_v3 }
 0x12e   : > { %v368_v5 = vmul.f32 %v709_v2, %v367_v4 }
 0x130   : > { %v369_v6 = vmul.f32 0.5, %v368_v5 }
 0x132   : > { %v370_v7 = vsub.f32 1.5, %v369_v6 }
 0x133   : > { %v711_v8 = vpop.eup %710 }
 0x134   : > { %v371_v9 = vmul.f32 %v709_v2, %v370_v7  ;;  %v377_v10 = vmul.f32 %v711_v8, %v365_v3  ;;  %vm383_vm5 = vweird.f32 %v711_v8 }
 0x135   : > { %vm384_vm7 = vmor %vm382_vm6, %vm383_vm5 }
 0x136   : > { %v378_v11 = vmul.f32 %v711_v8, %v377_v10  ;;  %v375_v12 = vsel %vm374_vm4, %v709_v2, %v371_v9 }
 0x137   : > { %v386_v15 = vmul.f32 %v375_v12, %v916_v29 }
 0x138   : > { %v379_v13 = vmul.f32 0.5, %v378_v11 }
 0x139   : > { %v391_v20 = vmul.f32 %v704_v16, %v386_v15 }
 0x13a   : > { %v380_v14 = vsub.f32 1.5, %v379_v13 }
 0x13b   : > { %v396_v23 = vadd.f32 %v705_v21, %v391_v20 }
 0x13c   : > { %v381_v17 = vmul.f32 %v711_v8, %v380_v14 }
 0x13e   : > { %v385_v18 = vsel %vm384_vm7, %v711_v8, %v381_v17 }
 0x13f   : > { %v387_v19 = vmul.f32 %v385_v18, %v921_v34  ;;  %v428_v34 = vperm.slane %v423_v26, 3 }
 0x141   : > { %v392_v22 = vmul.f32 %v704_v16, %v387_v19 }
 0x143   : > { %v397_v24 = vadd.f32 %v705_v21, %v392_v22 }
 0x145   : > { %v398_v25 = vpack.c.bf16 %v397_v24, %v396_v23 }
 0x147   : > { %634 = vmatmul.msk.bf16.vlgmr.msra.gmra.mxu0 %vm336_vm0, %v398_v25  ;;  %635 = vmatmul.msk.bf16.vlgmr.msra.gmra.mxu1 %vm336_vm0, %v398_v25 }
 0x148   : > { %636 = vmatmul.msk.bf16.vlgmr.msra.gmra.mxu2 %vm336_vm0, %v398_v25  ;;  %637 = vmatmul.msk.bf16.vlgmr.msra.gmra.mxu3 %vm336_vm0, %v398_v25 }
 0x1c4   : > { %v445_v29 = vpop.f32.mrf.mxu0  ;;  %v459_v30 = vpop.f32.mrf.mxu1 }
 0x1c5   : > { %v446_v31 = vadd.f32 %v445_v29, %v425_v27  ;;  %v460_v32 = vadd.f32 %v459_v30, %v426_v28 }
 0x1c7   : > { %492 = vst [vmem:[%s316_s15] sm:$0xff] %v446_v31 }
 0x1c8   : > { %493 = vst [vmem:[%s316_s15 + $0x8] sm:$0xff] %v460_v32 }
 0x1cb   : > { %v473_v35 = vpop.f32.mrf.mxu2  ;;  %v487_v36 = vpop.f32.mrf.mxu3 }
 0x1cc   : > { %v474_v37 = vadd.f32 %v473_v35, %v427_v33  ;;  %v488_v38 = vadd.f32 %v487_v36, %v428_v34  ;;  %v447_v39 = vpop.f32.mrf.mxu0  ;;  %v461_v40 = vpop.f32.mrf.mxu1 }
 0x1cd   : > { %v448_v41 = vadd.f32 %v447_v39, %v425_v27  ;;  %v462_v42 = vadd.f32 %v461_v40, %v426_v28 }
 0x1ce   : > { %494 = vst [vmem:[%s316_s15 + $0x10] sm:$0xff] %v474_v37 }
 0x1cf   : > { %495 = vst [vmem:[%s316_s15 + $0x18] sm:$0xff] %v488_v38 }
 0x1d0   : > { %496 = vst [vmem:[%s316_s15 + $0x20] sm:$0xff] %v448_v41 }
 0x1d1   : > { %497 = vst [vmem:[%s316_s15 + $0x28] sm:$0xff] %v462_v42 }
 0x1d3   : > { %v475_v43 = vpop.f32.mrf.mxu2  ;;  %v489_v44 = vpop.f32.mrf.mxu3 }
 0x1d4   : > { %v476_v45 = vadd.f32 %v475_v43, %v427_v33  ;;  %v490_v46 = vadd.f32 %v489_v44, %v428_v34 }
 0x1d6   : > { %498 = vst [vmem:[%s316_s15 + $0x30] sm:$0xff] %v476_v45 }
 0x1d7   : > { %499 = vst [vmem:[%s316_s15 + $0x38] sm:$0xff] %v490_v46 }
 0x1d8   : > { %739 = shalt.err (!%p736_p8)
}
 0x1d9   : > { %s793_s24 = smov 512   ;;  %s794_s15 = smov 1024  }
 0x1da   : > { %s795_s16 = smov 32  }
 0x1db   : > { %645 = dma.vmem_to_hbm [thread:$0]  (%p865_p5), %s517_s29, 1024, %s519_s7, %s501_s21, %s793_s24, %s794_s15, %s795_s16  }
 0x1dc PF: > { %s533_s17 = sand.u32 1, %s770_s18   ;;  %p648_p11 = pnand %p626_p10, %p876_p9 }
 0x1dd   : > { %s534_s25 = scalar_lea.sflag [#allocation4], %s533_s17 }
 0x1de   : > { %p649_p12 = pneg %p648_p11 }
 0x1e0   : > { %765 = dma.done.wait (%p649_p12), %s534_s25, 1024  }
 0x1e1   : > { %767 = vsyncadd (%p649_p12), %s534_s25, 4294966272  ;;  %s18_s23 = sadd.s32 1, %s790_s23   ;;  %s993_s18 = smov %s774_s19 }
 0x1e2   : > { %p15_p13 = scmp.ge.s32.totalorder %s18_s23, 4   ;;  %s994_s19 = smov %s778_s20 }
 0x1e3   : > { %s995_s20 = smov %s874_s30  ;;  %s996_s21 = smov %s786_s22 }
 0x1e4   : > { %s997_s22 = smov %s999_s26  ;;  %17 = sbr.rel (!%p15_p13) target bundleno = 4 (0x4), region = 109 }
 0x1e9   :  { %540 = vsyncpa [#allocation4], 1 }
 0x1ea   :  { %542 = vsyncpa [#allocation4 + $0x1], 1 }

// kernel: transformer_forward.9
= control target key start
LH: loop header
LB: loop body
LE: loop exit
PB: predicated region body
PF: predicated region fallthrough
CT: control target
= control target key end

     0   :  { %s801_s24 = smov 0   ;;  %s896_s0 = inlined_call_operand.vmem [shape: f32[16,32], index: 0, kind: input, shape index: {}]   ;;  %s897_s1 = inlined_call_operand.vmem [shape: f32[1,32], index: 1, kind: input, shape index: {}]   ;;  %s898_s2 = inlined_call_operand.vmem [shape: f32[1,32], index: 2, kind: input, shape index: {}]   ;;  %s899_s3 = inlined_call_operand.vmem [shape: f32[32,96], index: 3, kind: input, shape index: {}]   ;;  %s900_s4 = inlined_call_operand.vmem [shape: f32[1,96], index: 4, kind: input, shape index: {}]   ;;  %s901_s5 = inlined_call_operand.vmem [shape: f32[32,32], index: 5, kind: input, shape index: {}]   ;;  %s902_s6 = inlined_call_operand.vmem [shape: f32[1,32], index: 6, kind: input, shape index: {}]   ;;  %s903_s7 = inlined_call_operand.vmem [shape: f32[16,32], index: 7, kind: output, shape index: {}]  }
   0x1 LB: > { %s672_s25 = sadd.s32 4294967295, %s744_s24   ;;  %p676_p0 = scmp.ge.s32.totalorder %s744_s24, 1  ;;  %s744_s24 = sphi %s801_s24, %s17_s24  }
   0x2   : > { %p236_p1 = scmp.lt.s32.totalorder %s744_s24, 3 }
   0x4   : > { %p237_p2 = pnand %p676_p0, %p236_p1 }
   0x5   : > { %p266_p3 = scmp.lt.s32.totalorder (!%p237_p2), %s672_s25, 1  ;;  %s747_s21 = smov (!%p237_p2), 104  }
   0x6   : > { %240 = sbr.rel (%p237_p2) target bundleno = 1339 (0x53b), region = 48  ;;  %s748_s22 = smov (!%p237_p2), 120  }
   0x7   : > { %s749_s23 = smov (!%p237_p2), 96   ;;  %s750_s27 = smov (!%p237_p2), 72  }
   0x8   : > { %s751_s28 = smov (!%p237_p2), 88   ;;  %s753_s30 = smov (!%p237_p2), 80  }
   0x9   : > { %s754_s8 = smov (!%p237_p2), 64   ;;  %s755_s9 = smov (!%p237_p2), 56  }
   0xa   : > { %s756_s10 = smov (!%p237_p2), 40   ;;  %s757_s11 = smov (!%p237_p2), 48  }
   0xb   : > { %s905_s25 = smov (!%p266_p3, %s672_s25), 1  ;;  %vm278_vm0 = vcmask 261120   ;;  %v746_v2 = vmov 32.0   ;;  %v319_v14 = vld [vmem:[%s899_s3 + $0x10] sm:$0xff]  ;;  %v320_v15 = vld [vmem:[%s899_s3 + $0x18] sm:$0xff]  ;;  %v317_v17 = vld [vmem:[%s899_s3] sm:$0xff] }
   0xc   : > { %s677_s26 = sshll.u32 %s905_s25, 3  ;;  %718 = vrcp.f32 %v746_v2  ;;  %v322_v16 = vpack.c.bf16 %v320_v15, %v319_v14  ;;  %v318_v18 = vld [vmem:[%s899_s3 + $0x8] sm:$0xff]  ;;  %v714_v29 = vld [vmem:[%s897_s1] ss:$0 sm:$0xff]  ;;  %vm347_vm5 = vcmask 64512   ;;  %vm385_vm6 = vcmask 1043456  }
   0xd   : > { %s269_s29 = scalar_lea.vmem %s896_s0, %s677_s26  ;;  %v321_v19 = vpack.c.bf16 %v318_v18, %v317_v17  ;;  %v715_v32 = vld [vmem:[%s898_s2] ss:$0 sm:$0xff]  ;;  %s758_s12 = smov 8   ;;  %vm586_vm7 = vcmask 130048   ;;  %vm588_vm8 = vcmask 195584  }
   0xe   : > { %v817_v0 = vld [vmem:[%s269_s29] sm:$0xff]  ;;  %336 = vmatpush.bf16.msra.mxu0 %v322_v16  ;;  %s752_s29 = smov 112   ;;  %s759_s13 = smov 24  }
   0xf   : > { %v279_v1 = vsel %vm278_vm0, %v817_v0, 0.0  ;;  %v716_v36 = vld [vmem:[%s900_s4] ss:$0 sm:$0xff]  ;;  %s760_s14 = smov 16  }
  0x10   : > { %280 = vadd.xlane.f32.xlu0 %v279_v1 }
  0x12   : > { %v719_v3 = vpop.eup %718  ;;  %337 = vmatpush.bf16.msra.mxu0 %v321_v19 }
  0x13   : > { %v283_v4 = vmul.f32 32.0, %v719_v3  ;;  %vm287_vm1 = vweird.f32 %v719_v3 }
  0x15   : > { %v284_v5 = vsub.f32 1.0, %v283_v4 }
  0x17   : > { %v285_v6 = vmul.f32 %v719_v3, %v284_v5 }
  0x19   : > { %v286_v7 = vadd.f32 %v719_v3, %v285_v6 }
  0x1b   : > { %v288_v8 = vsel %vm287_vm1, %v719_v3, %v286_v7 }
  0x83   : > { %v281_v9 = vpop.xlane.xlu0 %280 }
  0x84   : > { %v289_v10 = vmul.f32 %v288_v8, %v281_v9 }
  0x86   : > { %v290_v11 = vsub.f32 %v817_v0, %v289_v10 }
  0x88   : > { %v291_v12 = vmul.f32 %v290_v11, %v290_v11 }
  0x8a   : > { %v292_v13 = vsel %vm278_vm0, %v291_v12, 0.0 }
  0x8b   : > { %293 = vadd.xlane.f32.xlu0 %v292_v13 }
  0xfe   : > { %v294_v20 = vpop.xlane.xlu0 %293 }
  0xff   : > { %v295_v21 = vmul.f32 %v294_v20, %v288_v8 }
 0x101   : > { %v296_v22 = vadd.f32 1e-05, %v295_v21 }
 0x103   : > { %720 = vrsqrt.f32 %v296_v22  ;;  %vm303_vm3 = vweird.f32 %v296_v22 }
 0x109   : > { %v721_v23 = vpop.eup %720 }
 0x10a   : > { %v298_v24 = vmul.f32 %v721_v23, %v296_v22  ;;  %vm304_vm2 = vweird.f32 %v721_v23 }
 0x10b   : > { %vm305_vm4 = vmor %vm303_vm3, %vm304_vm2 }
 0x10c   : > { %v299_v25 = vmul.f32 %v721_v23, %v298_v24 }
 0x10e   : > { %v300_v26 = vmul.f32 0.5, %v299_v25 }
 0x110   : > { %v301_v27 = vsub.f32 1.5, %v300_v26 }
 0x112   : > { %v302_v28 = vmul.f32 %v721_v23, %v301_v27 }
 0x114   : > { %v306_v30 = vsel %vm305_vm4, %v721_v23, %v302_v28 }
 0x115   : > { %v307_v31 = vmul.f32 %v306_v30, %v290_v11 }
 0x117   : > { %v311_v33 = vmul.f32 %v714_v29, %v307_v31 }
 0x119   : > { %v315_v34 = vadd.f32 %v715_v32, %v311_v33 }
 0x11b   : > { %v316_v35 = vpack.c.bf16 %v315_v34, %v315_v34 }
 0x11d   : > { %679 = vmatmul.msk.bf16.vlgmr.msra.gmra.mxu0 %vm278_vm0, %v316_v35 }
 0x19a   : > { %v339_v37 = vpop.f32.mrf.mxu0 }
 0x19b   : > { %v340_v38 = vadd.f32 %v716_v36, %v339_v37 }
 0x19d   : > { %v343_v39 = vpack.c.bf16 %v340_v38, %v340_v38 }
 0x19f   : > { %516 = vrot.lane.b32.xlu0 %v343_v39, %s747_s21  ;;  %402 = vrot.lane.b32.xlu2 %v343_v39, %s748_s22 }
 0x1a0   : > { %345 = vrot.lane.b32.xlu1 %v343_v39, %s749_s23 }
 0x1a2   : > { %v341_v40 = vpop.f32.mrf.mxu0 }
 0x1a7   : > { %518 = vrot.lane.b32.xlu2 %v343_v39, %s750_s27 }
 0x1a8   : > { %404 = vrot.lane.b32.xlu1 %v343_v39, %s751_s28 }
 0x1af   : > { %459 = vrot.lane.b32.xlu2 %v343_v39, %s752_s29 }
 0x1b0   : > { %461 = vrot.lane.b32.xlu1 %v343_v39, %s753_s30  ;;  %s273_s30 = scalar_lea.vmem %s903_s7, %s677_s26 }
 0x1f9   : > { %v403_v41 = vpop.permute.xlu2 %402 }
 0x201   : > { %v519_v44 = vpop.permute.xlu2 %518 }
 0x202   : > { %v524_v47 = vsel %vm347_vm5, %v519_v44, 0 }
 0x209   : > { %v460_v50 = vpop.permute.xlu2 %459 }
 0x211   : > { %v517_v51 = vpop.permute.xlu0 %516 }
 0x212   : > { %v346_v42 = vpop.permute.xlu1 %345 }
 0x213   : > { %v352_v43 = vsel %vm347_vm5, %v346_v42, 0 }
 0x214   : > { %361 = vmatpush.bf16.xpose.msra.mxu1 %v352_v43 }
 0x21a   : > { %v405_v45 = vpop.permute.xlu1 %404 }
 0x21b   : > { %680 = vmatmul.msk.bf16.vlgmr.msra.gmra.mxu1 %vm347_vm5, %v343_v39  ;;  %v410_v46 = vsel %vm347_vm5, %v405_v45, 0 }
 0x21c   : > { %419 = vmatpush.bf16.xpose.msra.mxu3 %v410_v46 }
 0x222   : > { %v462_v48 = vpop.permute.xlu1 %461 }
 0x223   : > { %682 = vmatmul.msk.bf16.vlgmr.msra.gmra.mxu3 %vm347_vm5, %v403_v41  ;;  %v467_v49 = vsel %vm347_vm5, %v462_v48, 0 }
 0x224   : > { %533 = vmatpush.bf16.xpose.msrb.mxu3 %v524_v47  ;;  %476 = vmatpush.bf16.xpose.msrb.mxu0 %v467_v49 }
 0x22b   : > { %684 = vmatmul.msk.bf16.vlgmr.msrb.gmra.mxu0 %vm347_vm5, %v460_v50 }
 0x233   : > { %686 = vmatmul.msk.bf16.vlgmr.msrb.gmra.mxu3 %vm347_vm5, %v517_v51 }
 0x298   : > { %v363_v52 = vpop.f32.mrf.mxu1 }
 0x299   : > { %v367_v53 = vmul.f32 0.35355338, %v363_v52 }
 0x29b   : > { %v368_v54 = vsel %vm347_vm5, %v367_v53, -inf }
 0x29c   : > { %369 = vmax.xlane.f32.xlu1 %v368_v54 }
 0x2a0   : > { %v365_v55 = vpop.f32.mrf.mxu1 }
 0x2a6   : > { %v421_v56 = vpop.f32.mrf.mxu3 }
 0x2a7   : > { %v425_v57 = vmul.f32 0.35355338, %v421_v56 }
 0x2a8   : > { %v478_v58 = vpop.f32.mrf.mxu0 }
 0x2a9   : > { %v426_v59 = vsel %vm347_vm5, %v425_v57, -inf  ;;  %v482_v60 = vmul.f32 0.35355338, %v478_v58  ;;  %v594_v58 = vld [vmem:[%s901_s5 + $0x18] sm:$0xff] }
 0x2aa   : > { %427 = vmax.xlane.f32.xlu2 %v426_v59  ;;  %v591_v59 = vld [vmem:[%s901_s5] sm:$0xff] }
 0x2ab   : > { %v483_v63 = vsel %vm347_vm5, %v482_v60, -inf }
 0x2ae   : > { %v423_v61 = vpop.f32.mrf.mxu3 }
 0x2af   : > { %v592_v61 = vld [vmem:[%s901_s5 + $0x8] sm:$0xff] }
 0x2b0   : > { %v480_v62 = vpop.f32.mrf.mxu0 }
 0x2b1   : > { %v595_v62 = vpack.c.bf16 %v592_v61, %v591_v59 }
 0x2b2   : > { %484 = vmax.xlane.f32.xlu2 %v483_v63 }
 0x2b6   : > { %v535_v1 = vpop.f32.mrf.mxu3 }
 0x2b7   : > { %v539_v2 = vmul.f32 0.35355338, %v535_v1 }
 0x2b9   : > { %v540_v3 = vsel %vm347_vm5, %v539_v2, -inf }
 0x2ba   : > { %541 = vmax.xlane.f32.xlu0 %v540_v3 }
 0x2be   : > { %v537_v4 = vpop.f32.mrf.mxu3 }
 0x2ca   : > { %380 = vrot.lane.b32.xlu2 %v343_v39, %s754_s8 }
 0x2ce   : > { %438 = vrot.lane.b32.xlu0 %v343_v39, %s755_s9 }
 0x2d2   : > { %552 = vrot.lane.b32.xlu2 %v343_v39, %s756_s10 }
 0x2d6   : > { %495 = vrot.lane.b32.xlu0 %v343_v39, %s757_s11 }
 0x30f   : > { %v370_v5 = vpop.xlane.xlu1 %369 }
 0x310   : > { %v371_v6 = vsub.f32 %v367_v53, %v370_v5 }
 0x312   : > { %v372_v7 = vmul.f32 1.442695, %v371_v6 }
 0x314   : > { %722 = vpow2.f32 %v372_v7  ;;  %v717_v7 = vld [vmem:[%s902_s6] ss:$0 sm:$0xff] }
 0x31a   : > { %v723_v8 = vpop.eup %722 }
 0x31b   : > { %v374_v9 = vsel %vm347_vm5, %v723_v8, 0.0 }
 0x31c   : > { %375 = vadd.xlane.f32.xlu1 %v374_v9 }
 0x31d   : > { %v428_v10 = vpop.xlane.xlu2 %427 }
 0x31e   : > { %v429_v11 = vsub.f32 %v425_v57, %v428_v10  ;;  %v593_v57 = vld [vmem:[%s901_s5 + $0x10] sm:$0xff] }
 0x320   : > { %v430_v12 = vmul.f32 1.442695, %v429_v11 }
 0x322   : > { %724 = vpow2.f32 %v430_v12 }
 0x325   : > { %v485_v13 = vpop.xlane.xlu2 %484 }
 0x326   : > { %v486_v20 = vsub.f32 %v482_v60, %v485_v13  ;;  %v596_v60 = vpack.c.bf16 %v594_v58, %v593_v57 }
 0x328   : > { %v725_v14 = vpop.eup %724  ;;  %v487_v22 = vmul.f32 1.442695, %v486_v20  ;;  %610 = vmatpush.bf16.msra.mxu0 %v596_v60 }
 0x329   : > { %v432_v15 = vsel %vm347_vm5, %v725_v14, 0.0 }
 0x32a   : > { %433 = vadd.xlane.f32.xlu1 %v432_v15 }
 0x32c   : > { %611 = vmatpush.bf16.msra.mxu0 %v595_v62 }
 0x32d   : > { %v542_v16 = vpop.xlane.xlu0 %541  ;;  %v381_v17 = vpop.permute.xlu2 %380 }
 0x32e   : > { %v543_v18 = vsub.f32 %v539_v2, %v542_v16  ;;  %v387_v19 = vsel %vm385_vm6, %v381_v17, 0 }
 0x32f   : > { %396 = vmatpush.bf16.msra.mxu2 %v387_v19 }
 0x330   : > { %v544_v21 = vmul.f32 1.442695, %v543_v18 }
 0x332   : > { %726 = vpow2.f32 %v544_v21 }
 0x333   : > { %728 = vpow2.f32 %v487_v22 }
 0x335   : > { %v553_v34 = vpop.permute.xlu2 %552 }
 0x336   : > { %v558_v36 = vsel %vm385_vm6, %v553_v34, 0 }
 0x338   : > { %v727_v23 = vpop.eup %726 }
 0x339   : > { %v546_v24 = vsel %vm347_vm5, %v727_v23, 0.0  ;;  %v729_v25 = vpop.eup %728 }
 0x33a   : > { %547 = vadd.xlane.f32.xlu1 %v546_v24  ;;  %v489_v28 = vsel %vm347_vm5, %v729_v25, 0.0 }
 0x340   : > { %v439_v26 = vpop.permute.xlu0 %438 }
 0x341   : > { %v444_v27 = vsel %vm385_vm6, %v439_v26, 0 }
 0x342   : > { %453 = vmatpush.bf16.msrb.mxu2 %v444_v27  ;;  %490 = vadd.xlane.f32.xlu1 %v489_v28 }
 0x348   : > { %v496_v29 = vpop.permute.xlu0 %495 }
 0x349   : > { %v501_v30 = vsel %vm385_vm6, %v496_v29, 0 }
 0x34a   : > { %510 = vmatpush.bf16.msrb.mxu1 %v501_v30 }
 0x38f   : > { %v376_v31 = vpop.xlane.xlu1 %375 }
 0x390   : > { %730 = vrcp.f32 %v376_v31 }
 0x396   : > { %v731_v32 = vpop.eup %730 }
 0x397   : > { %v378_v33 = vmul.f32 %v731_v32, %v723_v8 }
 0x399   : > { %v379_v35 = vpack.c.bf16 %v378_v33, %v378_v33 }
 0x39b   : > { %681 = vmatmul.msk.bf16.vlgmr.msra.gmra.mxu2 %vm347_vm5, %v379_v35 }
 0x39c   : > { %567 = vmatpush.bf16.msra.mxu2 %v558_v36 }
 0x39d   : > { %v434_v37 = vpop.xlane.xlu1 %433 }
 0x39e   : > { %732 = vrcp.f32 %v434_v37 }
 0x3a4   : > { %v733_v38 = vpop.eup %732 }
 0x3a5   : > { %v436_v39 = vmul.f32 %v733_v38, %v725_v14 }
 0x3a7   : > { %v437_v40 = vpack.c.bf16 %v436_v39, %v436_v39 }
 0x3ab   : > { %683 = vmatmul.msk.bf16.vlgmr.msrb.gmra.mxu2 %vm347_vm5, %v437_v40 }
 0x3ad   : > { %v548_v41 = vpop.xlane.xlu1 %547 }
 0x3ae   : > { %734 = vrcp.f32 %v548_v41 }
 0x3b4   : > { %v735_v42 = vpop.eup %734 }
 0x3b5   : > { %v550_v43 = vmul.f32 %v735_v42, %v727_v23  ;;  %v491_v44 = vpop.xlane.xlu1 %490 }
 0x3b6   : > { %736 = vrcp.f32 %v491_v44 }
 0x3b7   : > { %v551_v45 = vpack.c.bf16 %v550_v43, %v550_v43 }
 0x3bb   : > { %687 = vmatmul.msk.bf16.vlgmr.msra.gmra.mxu2 %vm347_vm5, %v551_v45 }
 0x3bc   : > { %v737_v46 = vpop.eup %736 }
 0x3bd   : > { %v493_v47 = vmul.f32 %v737_v46, %v729_v25 }
 0x3bf   : > { %v494_v48 = vpack.c.bf16 %v493_v47, %v493_v47 }
 0x3c1   : > { %685 = vmatmul.msk.bf16.vlgmr.msrb.gmra.mxu1 %vm347_vm5, %v494_v48 }
 0x41e   : > { %v398_v49 = vpop.f32.mrf.mxu2 }
 0x426   : > { %v400_v50 = vpop.f32.mrf.mxu2 }
 0x42e   : > { %v455_v51 = vpop.f32.mrf.mxu2 }
 0x42f   : > { %574 = vrot.lane.b32.xlu1 %v455_v51, %s758_s12 }
 0x436   : > { %v457_v52 = vpop.f32.mrf.mxu2 }
 0x43e   : > { %v512_v53 = vpop.f32.mrf.mxu1  ;;  %v569_v54 = vpop.f32.mrf.mxu2 }
 0x43f   : > { %582 = vrot.lane.b32.xlu0 %v569_v54, %s759_s13  ;;  %578 = vrot.lane.b32.xlu2 %v512_v53, %s760_s14 }
 0x446   : > { %v514_v55 = vpop.f32.mrf.mxu1  ;;  %v571_v56 = vpop.f32.mrf.mxu2 }
 0x499   : > { %v579_v2 = vpop.permute.xlu2 %578 }
 0x4a1   : > { %v575_v63 = vpop.permute.xlu1 %574 }
 0x4a2   : > { %v585_v1 = vsel %vm347_vm5, %v398_v49, %v575_v63 }
 0x4a3   : > { %v587_v4 = vsel %vm586_vm7, %v585_v1, %v579_v2 }
 0x4b1   : > { %v583_v3 = vpop.permute.xlu0 %582 }
 0x4b2   : > { %v589_v5 = vsel %vm588_vm8, %v587_v4, %v583_v3 }
 0x4b3   : > { %v590_v6 = vpack.c.bf16 %v589_v5, %v589_v5 }
 0x4b5   : > { %688 = vmatmul.msk.bf16.vlgmr.msra.gmra.mxu0 %vm278_vm0, %v590_v6 }
 0x532   : > { %v613_v8 = vpop.f32.mrf.mxu0 }
 0x533   : > { %v614_v9 = vadd.f32 %v717_v7, %v613_v8 }
 0x535   : > { %v617_v10 = vadd.f32 %v614_v9, %v817_v0 }
 0x537   : > { %618 = vst.msk [vmem:[%s273_s30] sm:$0xff] %vm278_vm0, %v617_v10 }
 0x53a   : > { %v615_v11 = vpop.f32.mrf.mxu0 }
 0x53b PF: > { %s17_s24 = sadd.s32 1, %s744_s24  }
 0x53c   : > { %p14_p4 = scmp.ge.s32.totalorder %s17_s24, 4  }
 0x53e   :  { %16 = sbr.rel (!%p14_p4) target bundleno = 1 (0x1), region = 78 }

</bundles_post_ra>
